<compile_context>
chip_gen: v7x
topology: tpu7x:2x2x1
jax: 0.10.0
libtpu: 0.0.40
codegen_flags: <defaults>
</compile_context>

<pallas_src>
import functools
import jax
import jax.numpy as jnp
from jax.experimental import pallas as pl
from jax.experimental.pallas import tpu as pltpu

# ---- configuration mirroring networkParams ---------------------------------
XDOT_DIM = 6
ACTION_DIM = 2
HIDDEN = 32           # networkParams['dynamicsModel']['hidden_size']
NUM_LAYERS = 2        # networkParams['dynamicsModel']['num_layers']
STATE_DIM = 4         # networkParams['stateTransitionDim']
VAR_LOW_BOUND = 1e-3  # networkParams['dynamicsModel']['varLowBound']
STATIC_VAR = False    # networkParams['dynamicsModel'].get('staticVar', False)
BATCH = 2
SEQ = 8
OUT_LANES = 128       # lane-dense padded output width


# ---- Pallas kernel ----------------------------------------------------------
def _dynamics_kernel(x_ref,            # (T*B, Din)  time-major, flattened
                     wih0_ref,         # (Din, 8H): [wih0 | 0]
                     b8_ref,           # (1, 8H):   [b_ih0+b_hh0 | b_ih1+b_hh1]
                     wtop_ref,         # (H, 8H):   [whh0 | wih1]
                     wbot_ref,         # (H, 8H):   [0    | whh1]
                     wh_ref, bh_ref,   # fused head: (H, 128), (1, 128)
                     dmask_ref,        # (1, 128) f32, 1.0 on diagonal lanes
                     out_ref,          # (B, 128) lane-dense output
                     xg_ref,           # scratch: (T, B, 8H)
                     *, seq_len, batch, hidden, var_low_bound):
    B, H = batch, hidden
    f32 = jnp.float32

    w_top = wtop_ref[...]
    w_bot = wbot_ref[...]

    # Hoisted input projection for ALL timesteps: one (T*B, Din) @ (Din, 8H)
    # matmul producing [x(t)@wih0 + b0 | b1] rows, staged into (T, B, 8H).
    xg8 = jnp.dot(x_ref[...], wih0_ref[...], preferred_element_type=f32) + b8_ref[...]
    for t in range(seq_len):
        xg_ref[t] = xg8[t * B:(t + 1) * B, :]

    def lstm_update(sg, tg, lo, c):
        # PyTorch gate order i, f, g, o at lane offset `lo`.
        i_g = sg[:, lo + 0 * H: lo + 1 * H]
        f_g = sg[:, lo + 1 * H: lo + 2 * H]
        g_g = tg[:, lo + 2 * H: lo + 3 * H]
        o_g = sg[:, lo + 3 * H: lo + 4 * H]
        c_new = f_g * c + i_g * g_g
        h_new = o_g * jnp.tanh(c_new)
        return h_new, c_new

    # ---- prologue: layer-0 step t=0 (h0(-1)=0 -> gates are the projection) --
    row0 = xg_ref[0]
    g0 = row0[:, :4 * H]
    h0, c0 = lstm_update(jax.nn.sigmoid(g0), jnp.tanh(g0), 0,
                         jnp.zeros((B, H), f32))
    h1 = jnp.zeros((B, H), f32)
    c1 = jnp.zeros((B, H), f32)

    # ---- skewed recurrence: one serial matmul step per timestep -------------
    #   comb[:, :4H] = h0(s) @ whh0                   -> gates0(s+1) recurrent part
    #   comb[:, 4H:] = h0(s) @ wih1 + h1(s-1) @ whh1  -> gates1(s) (minus bias)
    for s in range(seq_len):
        comb = (jnp.dot(h0, w_top, preferred_element_type=f32) +
                jnp.dot(h1, w_bot, preferred_element_type=f32))
        x_idx = s + 1 if s + 1 < seq_len else s   # last step: layer-0 half unused
        gates = comb + xg_ref[x_idx]              # (B, 8H)
        sg = jax.nn.sigmoid(gates)                # full-vreg EUP ops
        tg = jnp.tanh(gates)
        h1, c1 = lstm_update(sg, tg, 4 * H, c1)   # layer 1, time s
        if s + 1 < seq_len:
            h0, c0 = lstm_update(sg, tg, 0, c0)   # layer 0, time s+1

    # ---- fused mean/LVar head on lane-padded (B, 128) layout ----------------
    # lanes [0:S] -> mean; [S:S+S*S] -> LVar flat (row-major); strict-upper and
    # pad lanes have zeroed weight columns; diagonal lanes get softplus + bound.
    head = jnp.dot(h1, wh_ref[...], preferred_element_type=f32) + bh_ref[...]
    dmask = jnp.broadcast_to(dmask_ref[...] != 0.0, head.shape)
    out_ref[...] = jnp.where(
        dmask, jax.nn.softplus(head) + jnp.float32(var_low_bound), head)


# ---- wrapper ----------------------------------------------------------------
def adaptive_dynamics_forward(x_window, action_window, params):
    """x_window: (B, T, xdotDim), action_window: (B, T, actionDim) -> (mean, LVar)."""
    H, S = HIDDEN, STATE_DIM
    din = XDOT_DIM + ACTION_DIM

    connected = jnp.concatenate([x_window, action_window], axis=-1)
    B, T, _ = connected.shape
    # time-major flattened (T*B, Din) so the layer-0 projection is one matmul
    x_tm = jnp.transpose(connected, (1, 0, 2)).reshape(T * B, din).astype(jnp.float32)

    # layer-0 input projection padded to 8H columns (right 4H zero) so the
    # hoisted matmul emits [x@wih0 + b0 | b1] rows directly.
    wih0_pad = jnp.zeros((din, 8 * H), jnp.float32).at[:, :4 * H].set(
        params['w_ih_0'].T)
    b8 = jnp.concatenate([params['b_ih_0'] + params['b_hh_0'],
                          params['b_ih_1'] + params['b_hh_1']]).reshape(1, 8 * H)

    # Skewed recurrent weights: [h0, h1] @ [[whh0, wih1], [0, whh1]], split so
    # there is no per-step lane concat (two overlapping MXU pushes instead).
    w_top = jnp.concatenate([params['w_hh_0'].T, params['w_ih_1'].T], axis=1)      # (H, 8H)
    w_bot = jnp.zeros((H, 8 * H), jnp.float32).at[:, 4 * H:].set(params['w_hh_1'].T)

    # Fused + lane-padded output head; strict-upper-triangle and pad columns are
    # zeroed here so the in-kernel epilogue is a single masked softplus.
    w_head = jnp.concatenate([params['w_mean'].T, params['w_lvar'].T], axis=1)     # (H, S+S*S)
    b_head = jnp.concatenate([params['b_mean'], params['b_lvar']])
    if STATIC_VAR:
        # LVarFC(zeros) == bias: drop the LVar weight columns, keep the bias.
        w_head = w_head.at[:, S:].set(0.0)

    flat = jnp.arange(S * S)
    row, col = flat // S, flat % S
    lane_keep = jnp.concatenate(
        [jnp.ones((S,), jnp.float32), (col <= row).astype(jnp.float32)])           # zero strict upper
    w_head = w_head * lane_keep[None, :]
    b_head = b_head * lane_keep

    w_head_pad = jnp.zeros((H, OUT_LANES), jnp.float32).at[:, :S + S * S].set(w_head)
    b_head_pad = jnp.zeros((1, OUT_LANES), jnp.float32).at[:, :S + S * S].set(b_head)

    diag_mask = jnp.zeros((OUT_LANES,), jnp.float32).at[S + flat].set(
        (row == col).astype(jnp.float32)).reshape(1, OUT_LANES)

    kernel = functools.partial(
        _dynamics_kernel,
        seq_len=T, batch=B, hidden=H, var_low_bound=VAR_LOW_BOUND)

    vmem = pl.BlockSpec(memory_space=pltpu.MemorySpace.VMEM)
    args = (x_tm, wih0_pad, b8, w_top, w_bot, w_head_pad, b_head_pad, diag_mask)
    out = pl.pallas_call(
        kernel,
        out_shape=jax.ShapeDtypeStruct((B, OUT_LANES), jnp.float32),
        in_specs=[vmem] * len(args),
        out_specs=vmem,
        scratch_shapes=[pltpu.VMEM((T, B, 8 * H), jnp.float32)],
    )(*args)

    mean = out[:, :S]
    lvar = out[:, S:S + S * S].reshape(B, S, S)
    return mean, lvar


# ---- pure-JAX reference (same math, no Pallas) for a sanity check -----------
def _reference_forward(x_window, action_window, params):
    x = jnp.concatenate([x_window, action_window], axis=-1).astype(jnp.float32)
    B, T, _ = x.shape
    H, S = HIDDEN, STATE_DIM

    def cell(x_t, h, c, wih, whh, bih, bhh):
        gates = x_t @ wih.T + bih + h @ whh.T + bhh
        i_g, f_g, g_g, o_g = jnp.split(gates, 4, axis=-1)
        c_new = jax.nn.sigmoid(f_g) * c + jax.nn.sigmoid(i_g) * jnp.tanh(g_g)
        h_new = jax.nn.sigmoid(o_g) * jnp.tanh(c_new)
        return h_new, c_new

    h0 = c0 = h1 = c1 = jnp.zeros((B, H), jnp.float32)
    for t in range(T):
        h0, c0 = cell(x[:, t, :], h0, c0, params['w_ih_0'], params['w_hh_0'],
                      params['b_ih_0'], params['b_hh_0'])
        h1, c1 = cell(h0, h1, c1, params['w_ih_1'], params['w_hh_1'],
                      params['b_ih_1'], params['b_hh_1'])
    connected = h1
    mean = connected @ params['w_mean'].T + params['b_mean']
    lvar_in = jnp.zeros_like(connected) if STATIC_VAR else connected
    lvar = (lvar_in @ params['w_lvar'].T + params['b_lvar']).reshape(B, S, S)
    diag = jnp.diagonal(jax.nn.softplus(lvar) + VAR_LOW_BOUND, axis1=-2, axis2=-1)
    diag = diag[..., None] * jnp.eye(S, dtype=jnp.float32)
    off = jnp.tril(lvar, k=-1)
    return mean, diag + off


# ---- deterministic parameter init (PyTorch-like uniform) ---------------------
def _init_params(key):
    H, S = HIDDEN, STATE_DIM
    din = XDOT_DIM + ACTION_DIM
    bound = 1.0 / (H ** 0.5)
    shapes = {
        'w_ih_0': (4 * H, din), 'w_hh_0': (4 * H, H), 'b_ih_0': (4 * H,), 'b_hh_0': (4 * H,),
        'w_ih_1': (4 * H, H),   'w_hh_1': (4 * H, H), 'b_ih_1': (4 * H,), 'b_hh_1': (4 * H,),
        'w_mean': (S, H), 'b_mean': (S,),
        'w_lvar': (S * S, H), 'b_lvar': (S * S,),
    }
    params = {}
    for name, shp in shapes.items():
        key, sub = jax.random.split(key)
        params[name] = jax.random.uniform(sub, shp, jnp.float32, -bound, bound)
    return params


if __name__ == "__main__":
    key = jax.random.PRNGKey(0)
    kp, kx, ka = jax.random.split(key, 3)
    params = _init_params(kp)

    x_window = jax.random.normal(kx, (BATCH, SEQ, XDOT_DIM), jnp.float32)
    action_window = jax.random.normal(ka, (BATCH, SEQ, ACTION_DIM), jnp.float32)

    mean, lvar = adaptive_dynamics_forward(x_window, action_window, params)
    jax.block_until_ready((mean, lvar))

    mean_ref, lvar_ref = _reference_forward(x_window, action_window, params)
    assert mean.shape == (BATCH, STATE_DIM)
    assert lvar.shape == (BATCH, STATE_DIM, STATE_DIM)
    assert jnp.allclose(mean, mean_ref, atol=2e-5, rtol=1e-4)
    assert jnp.allclose(lvar, lvar_ref, atol=2e-5, rtol=1e-4)

    print("KERNEL_OK")
</pallas_src>

<mosaic_0001>
module attributes {stable_mosaic.version = 11 : i64} {
  func.func @_dynamics_kernel(%arg0: memref<16x8xf32, #tpu.memory_space<vmem>>, %arg1: memref<8x256xf32, #tpu.memory_space<vmem>>, %arg2: memref<1x256xf32, #tpu.memory_space<vmem>>, %arg3: memref<32x256xf32, #tpu.memory_space<vmem>>, %arg4: memref<32x256xf32, #tpu.memory_space<vmem>>, %arg5: memref<32x128xf32, #tpu.memory_space<vmem>>, %arg6: memref<1x128xf32, #tpu.memory_space<vmem>>, %arg7: memref<1x128xf32, #tpu.memory_space<vmem>>, %arg8: memref<2x128xf32, #tpu.memory_space<vmem>>, %arg9: memref<8x2x256xf32, #tpu.memory_space<vmem>>) attributes {dimension_semantics = [], scalar_prefetch = 0 : i64, scratch_operands = 1 : i64, tpu.core_type = #tpu.core_type<tc>} {
    %c0 = arith.constant 0 : index
    %c0_0 = arith.constant 0 : index
    %0 = vector.load %arg3[%c0, %c0_0] : memref<32x256xf32, #tpu.memory_space<vmem>>, vector<32x256xf32>
    %c0_1 = arith.constant 0 : index
    %c0_2 = arith.constant 0 : index
    %1 = vector.load %arg4[%c0_1, %c0_2] : memref<32x256xf32, #tpu.memory_space<vmem>>, vector<32x256xf32>
    %c0_3 = arith.constant 0 : index
    %c0_4 = arith.constant 0 : index
    %2 = vector.load %arg0[%c0_3, %c0_4] : memref<16x8xf32, #tpu.memory_space<vmem>>, vector<16x8xf32>
    %c0_5 = arith.constant 0 : index
    %c0_6 = arith.constant 0 : index
    %3 = vector.load %arg1[%c0_5, %c0_6] : memref<8x256xf32, #tpu.memory_space<vmem>>, vector<8x256xf32>
    %cst = arith.constant dense<0.000000e+00> : vector<16x256xf32>
    %4 = tpu.matmul %2, %3, %cst {dimension_numbers = #tpu.dot_dimension_numbers<[1], [0], [0], [1], [0, 0, 1, 1], [], []>} : vector<16x8xf32>, vector<8x256xf32>, vector<16x256xf32> -> vector<16x256xf32>
    %c0_7 = arith.constant 0 : index
    %c0_8 = arith.constant 0 : index
    %5 = vector.load %arg2[%c0_7, %c0_8] : memref<1x256xf32, #tpu.memory_space<vmem>>, vector<1x256xf32>
    %6 = vector.broadcast %5 : vector<1x256xf32> to vector<16x256xf32>
    %7 = arith.addf %4, %6 : vector<16x256xf32>
    %8 = vector.extract_strided_slice %7 {offsets = [0, 0], sizes = [2, 256], strides = [1, 1]} : vector<16x256xf32> to vector<2x256xf32>
    %c0_9 = arith.constant 0 : index
    %c0_10 = arith.constant 0 : index
    %c0_11 = arith.constant 0 : index
    %9 = vector.load %arg9[%c0_9, %c0_10, %c0_11] : memref<8x2x256xf32, #tpu.memory_space<vmem>>, vector<1x2x256xf32>
    %10 = vector.shape_cast %9 : vector<1x2x256xf32> to vector<2x256xf32>
    %11 = vector.shape_cast %8 : vector<2x256xf32> to vector<1x2x256xf32>
    tpu.vector_store %arg9[%c0_9, %c0_10, %c0_11], %11 {strides = array<i32>} : memref<8x2x256xf32, #tpu.memory_space<vmem>>, vector<1x2x256xf32>,
    %12 = vector.extract_strided_slice %7 {offsets = [2, 0], sizes = [2, 256], strides = [1, 1]} : vector<16x256xf32> to vector<2x256xf32>
    %c1 = arith.constant 1 : index
    %c0_12 = arith.constant 0 : index
    %c0_13 = arith.constant 0 : index
    %13 = vector.load %arg9[%c1, %c0_12, %c0_13] : memref<8x2x256xf32, #tpu.memory_space<vmem>>, vector<1x2x256xf32>
    %14 = vector.shape_cast %13 : vector<1x2x256xf32> to vector<2x256xf32>
    %15 = vector.shape_cast %12 : vector<2x256xf32> to vector<1x2x256xf32>
    tpu.vector_store %arg9[%c1, %c0_12, %c0_13], %15 {strides = array<i32>} : memref<8x2x256xf32, #tpu.memory_space<vmem>>, vector<1x2x256xf32>,
    %16 = vector.extract_strided_slice %7 {offsets = [4, 0], sizes = [2, 256], strides = [1, 1]} : vector<16x256xf32> to vector<2x256xf32>
    %c2 = arith.constant 2 : index
    %c0_14 = arith.constant 0 : index
    %c0_15 = arith.constant 0 : index
    %17 = vector.load %arg9[%c2, %c0_14, %c0_15] : memref<8x2x256xf32, #tpu.memory_space<vmem>>, vector<1x2x256xf32>
    %18 = vector.shape_cast %17 : vector<1x2x256xf32> to vector<2x256xf32>
    %19 = vector.shape_cast %16 : vector<2x256xf32> to vector<1x2x256xf32>
    tpu.vector_store %arg9[%c2, %c0_14, %c0_15], %19 {strides = array<i32>} : memref<8x2x256xf32, #tpu.memory_space<vmem>>, vector<1x2x256xf32>,
    %20 = vector.extract_strided_slice %7 {offsets = [6, 0], sizes = [2, 256], strides = [1, 1]} : vector<16x256xf32> to vector<2x256xf32>
    %c3 = arith.constant 3 : index
    %c0_16 = arith.constant 0 : index
    %c0_17 = arith.constant 0 : index
    %21 = vector.load %arg9[%c3, %c0_16, %c0_17] : memref<8x2x256xf32, #tpu.memory_space<vmem>>, vector<1x2x256xf32>
    %22 = vector.shape_cast %21 : vector<1x2x256xf32> to vector<2x256xf32>
    %23 = vector.shape_cast %20 : vector<2x256xf32> to vector<1x2x256xf32>
    tpu.vector_store %arg9[%c3, %c0_16, %c0_17], %23 {strides = array<i32>} : memref<8x2x256xf32, #tpu.memory_space<vmem>>, vector<1x2x256xf32>,
    %24 = vector.extract_strided_slice %7 {offsets = [8, 0], sizes = [2, 256], strides = [1, 1]} : vector<16x256xf32> to vector<2x256xf32>
    %c4 = arith.constant 4 : index
    %c0_18 = arith.constant 0 : index
    %c0_19 = arith.constant 0 : index
    %25 = vector.load %arg9[%c4, %c0_18, %c0_19] : memref<8x2x256xf32, #tpu.memory_space<vmem>>, vector<1x2x256xf32>
    %26 = vector.shape_cast %25 : vector<1x2x256xf32> to vector<2x256xf32>
    %27 = vector.shape_cast %24 : vector<2x256xf32> to vector<1x2x256xf32>
    tpu.vector_store %arg9[%c4, %c0_18, %c0_19], %27 {strides = array<i32>} : memref<8x2x256xf32, #tpu.memory_space<vmem>>, vector<1x2x256xf32>,
    %28 = vector.extract_strided_slice %7 {offsets = [10, 0], sizes = [2, 256], strides = [1, 1]} : vector<16x256xf32> to vector<2x256xf32>
    %c5 = arith.constant 5 : index
    %c0_20 = arith.constant 0 : index
    %c0_21 = arith.constant 0 : index
    %29 = vector.load %arg9[%c5, %c0_20, %c0_21] : memref<8x2x256xf32, #tpu.memory_space<vmem>>, vector<1x2x256xf32>
    %30 = vector.shape_cast %29 : vector<1x2x256xf32> to vector<2x256xf32>
    %31 = vector.shape_cast %28 : vector<2x256xf32> to vector<1x2x256xf32>
    tpu.vector_store %arg9[%c5, %c0_20, %c0_21], %31 {strides = array<i32>} : memref<8x2x256xf32, #tpu.memory_space<vmem>>, vector<1x2x256xf32>,
    %32 = vector.extract_strided_slice %7 {offsets = [12, 0], sizes = [2, 256], strides = [1, 1]} : vector<16x256xf32> to vector<2x256xf32>
    %c6 = arith.constant 6 : index
    %c0_22 = arith.constant 0 : index
    %c0_23 = arith.constant 0 : index
    %33 = vector.load %arg9[%c6, %c0_22, %c0_23] : memref<8x2x256xf32, #tpu.memory_space<vmem>>, vector<1x2x256xf32>
    %34 = vector.shape_cast %33 : vector<1x2x256xf32> to vector<2x256xf32>
    %35 = vector.shape_cast %32 : vector<2x256xf32> to vector<1x2x256xf32>
    tpu.vector_store %arg9[%c6, %c0_22, %c0_23], %35 {strides = array<i32>} : memref<8x2x256xf32, #tpu.memory_space<vmem>>, vector<1x2x256xf32>,
    %36 = vector.extract_strided_slice %7 {offsets = [14, 0], sizes = [2, 256], strides = [1, 1]} : vector<16x256xf32> to vector<2x256xf32>
    %c7 = arith.constant 7 : index
    %c0_24 = arith.constant 0 : index
    %c0_25 = arith.constant 0 : index
    %37 = vector.load %arg9[%c7, %c0_24, %c0_25] : memref<8x2x256xf32, #tpu.memory_space<vmem>>, vector<1x2x256xf32>
    %38 = vector.shape_cast %37 : vector<1x2x256xf32> to vector<2x256xf32>
    %39 = vector.shape_cast %36 : vector<2x256xf32> to vector<1x2x256xf32>
    tpu.vector_store %arg9[%c7, %c0_24, %c0_25], %39 {strides = array<i32>} : memref<8x2x256xf32, #tpu.memory_space<vmem>>, vector<1x2x256xf32>,
    %c0_26 = arith.constant 0 : index
    %c0_27 = arith.constant 0 : index
    %c0_28 = arith.constant 0 : index
    %40 = vector.load %arg9[%c0_26, %c0_27, %c0_28] : memref<8x2x256xf32, #tpu.memory_space<vmem>>, vector<1x2x256xf32>
    %41 = vector.shape_cast %40 : vector<1x2x256xf32> to vector<2x256xf32>
    %42 = vector.extract_strided_slice %41 {offsets = [0, 0], sizes = [2, 128], strides = [1, 1]} : vector<2x256xf32> to vector<2x128xf32>
    %43 = arith.negf %42 : vector<2x128xf32>
    %44 = math.exp %43 : vector<2x128xf32>
    %cst_29 = arith.constant 1.000000e+00 : f32
    %45 = vector.broadcast %cst_29 : f32 to vector<2x128xf32>
    %46 = arith.addf %45, %44 : vector<2x128xf32>
    %47 = arith.divf %45, %46 : vector<2x128xf32>
    %48 = math.tanh %42 : vector<2x128xf32>
    %cst_30 = arith.constant 0.000000e+00 : f32
    %49 = vector.broadcast %cst_30 : f32 to vector<2x32xf32>
    %50 = vector.extract_strided_slice %47 {offsets = [0, 0], sizes = [2, 32], strides = [1, 1]} : vector<2x128xf32> to vector<2x32xf32>
    %51 = vector.extract_strided_slice %47 {offsets = [0, 32], sizes = [2, 32], strides = [1, 1]} : vector<2x128xf32> to vector<2x32xf32>
    %52 = vector.extract_strided_slice %48 {offsets = [0, 64], sizes = [2, 32], strides = [1, 1]} : vector<2x128xf32> to vector<2x32xf32>
    %53 = vector.extract_strided_slice %47 {offsets = [0, 96], sizes = [2, 32], strides = [1, 1]} : vector<2x128xf32> to vector<2x32xf32>
    %54 = arith.mulf %51, %49 : vector<2x32xf32>
    %55 = arith.mulf %50, %52 : vector<2x32xf32>
    %56 = arith.addf %54, %55 : vector<2x32xf32>
    %57 = math.tanh %56 : vector<2x32xf32>
    %58 = arith.mulf %53, %57 : vector<2x32xf32>
    %cst_31 = arith.constant 0.000000e+00 : f32
    %59 = vector.broadcast %cst_31 : f32 to vector<2x32xf32>
    %cst_32 = arith.constant 0.000000e+00 : f32
    %60 = vector.broadcast %cst_32 : f32 to vector<2x32xf32>
    %cst_33 = arith.constant dense<0.000000e+00> : vector<2x256xf32>
    %61 = tpu.matmul %58, %0, %cst_33 {dimension_numbers = #tpu.dot_dimension_numbers<[1], [0], [0], [1], [0, 0, 1, 1], [], []>} : vector<2x32xf32>, vector<32x256xf32>, vector<2x256xf32> -> vector<2x256xf32>
    %cst_34 = arith.constant dense<0.000000e+00> : vector<2x256xf32>
    %62 = tpu.matmul %59, %1, %cst_34 {dimension_numbers = #tpu.dot_dimension_numbers<[1], [0], [0], [1], [0, 0, 1, 1], [], []>} : vector<2x32xf32>, vector<32x256xf32>, vector<2x256xf32> -> vector<2x256xf32>
    %63 = arith.addf %61, %62 : vector<2x256xf32>
    %c1_35 = arith.constant 1 : index
    %c0_36 = arith.constant 0 : index
    %c0_37 = arith.constant 0 : index
    %64 = vector.load %arg9[%c1_35, %c0_36, %c0_37] : memref<8x2x256xf32, #tpu.memory_space<vmem>>, vector<1x2x256xf32>
    %65 = vector.shape_cast %64 : vector<1x2x256xf32> to vector<2x256xf32>
    %66 = arith.addf %63, %65 : vector<2x256xf32>
    %67 = arith.negf %66 : vector<2x256xf32>
    %68 = math.exp %67 : vector<2x256xf32>
    %cst_38 = arith.constant 1.000000e+00 : f32
    %69 = vector.broadcast %cst_38 : f32 to vector<2x256xf32>
    %70 = arith.addf %69, %68 : vector<2x256xf32>
    %71 = arith.divf %69, %70 : vector<2x256xf32>
    %72 = math.tanh %66 : vector<2x256xf32>
    %73 = vector.extract_strided_slice %71 {offsets = [0, 128], sizes = [2, 32], strides = [1, 1]} : vector<2x256xf32> to vector<2x32xf32>
    %74 = vector.extract_strided_slice %71 {offsets = [0, 160], sizes = [2, 32], strides = [1, 1]} : vector<2x256xf32> to vector<2x32xf32>
    %75 = vector.extract_strided_slice %72 {offsets = [0, 192], sizes = [2, 32], strides = [1, 1]} : vector<2x256xf32> to vector<2x32xf32>
    %76 = vector.extract_strided_slice %71 {offsets = [0, 224], sizes = [2, 32], strides = [1, 1]} : vector<2x256xf32> to vector<2x32xf32>
    %77 = arith.mulf %74, %60 : vector<2x32xf32>
    %78 = arith.mulf %73, %75 : vector<2x32xf32>
    %79 = arith.addf %77, %78 : vector<2x32xf32>
    %80 = math.tanh %79 : vector<2x32xf32>
    %81 = arith.mulf %76, %80 : vector<2x32xf32>
    %82 = vector.extract_strided_slice %71 {offsets = [0, 0], sizes = [2, 32], strides = [1, 1]} : vector<2x256xf32> to vector<2x32xf32>
    %83 = vector.extract_strided_slice %71 {offsets = [0, 32], sizes = [2, 32], strides = [1, 1]} : vector<2x256xf32> to vector<2x32xf32>
    %84 = vector.extract_strided_slice %72 {offsets = [0, 64], sizes = [2, 32], strides = [1, 1]} : vector<2x256xf32> to vector<2x32xf32>
    %85 = vector.extract_strided_slice %71 {offsets = [0, 96], sizes = [2, 32], strides = [1, 1]} : vector<2x256xf32> to vector<2x32xf32>
    %86 = arith.mulf %83, %56 : vector<2x32xf32>
    %87 = arith.mulf %82, %84 : vector<2x32xf32>
    %88 = arith.addf %86, %87 : vector<2x32xf32>
    %89 = math.tanh %88 : vector<2x32xf32>
    %90 = arith.mulf %85, %89 : vector<2x32xf32>
    %cst_39 = arith.constant dense<0.000000e+00> : vector<2x256xf32>
    %91 = tpu.matmul %90, %0, %cst_39 {dimension_numbers = #tpu.dot_dimension_numbers<[1], [0], [0], [1], [0, 0, 1, 1], [], []>} : vector<2x32xf32>, vector<32x256xf32>, vector<2x256xf32> -> vector<2x256xf32>
    %cst_40 = arith.constant dense<0.000000e+00> : vector<2x256xf32>
    %92 = tpu.matmul %81, %1, %cst_40 {dimension_numbers = #tpu.dot_dimension_numbers<[1], [0], [0], [1], [0, 0, 1, 1], [], []>} : vector<2x32xf32>, vector<32x256xf32>, vector<2x256xf32> -> vector<2x256xf32>
    %93 = arith.addf %91, %92 : vector<2x256xf32>
    %c2_41 = arith.constant 2 : index
    %c0_42 = arith.constant 0 : index
    %c0_43 = arith.constant 0 : index
    %94 = vector.load %arg9[%c2_41, %c0_42, %c0_43] : memref<8x2x256xf32, #tpu.memory_space<vmem>>, vector<1x2x256xf32>
    %95 = vector.shape_cast %94 : vector<1x2x256xf32> to vector<2x256xf32>
    %96 = arith.addf %93, %95 : vector<2x256xf32>
    %97 = arith.negf %96 : vector<2x256xf32>
    %98 = math.exp %97 : vector<2x256xf32>
    %cst_44 = arith.constant 1.000000e+00 : f32
    %99 = vector.broadcast %cst_44 : f32 to vector<2x256xf32>
    %100 = arith.addf %99, %98 : vector<2x256xf32>
    %101 = arith.divf %99, %100 : vector<2x256xf32>
    %102 = math.tanh %96 : vector<2x256xf32>
    %103 = vector.extract_strided_slice %101 {offsets = [0, 128], sizes = [2, 32], strides = [1, 1]} : vector<2x256xf32> to vector<2x32xf32>
    %104 = vector.extract_strided_slice %101 {offsets = [0, 160], sizes = [2, 32], strides = [1, 1]} : vector<2x256xf32> to vector<2x32xf32>
    %105 = vector.extract_strided_slice %102 {offsets = [0, 192], sizes = [2, 32], strides = [1, 1]} : vector<2x256xf32> to vector<2x32xf32>
    %106 = vector.extract_strided_slice %101 {offsets = [0, 224], sizes = [2, 32], strides = [1, 1]} : vector<2x256xf32> to vector<2x32xf32>
    %107 = arith.mulf %104, %79 : vector<2x32xf32>
    %108 = arith.mulf %103, %105 : vector<2x32xf32>
    %109 = arith.addf %107, %108 : vector<2x32xf32>
    %110 = math.tanh %109 : vector<2x32xf32>
    %111 = arith.mulf %106, %110 : vector<2x32xf32>
    %112 = vector.extract_strided_slice %101 {offsets = [0, 0], sizes = [2, 32], strides = [1, 1]} : vector<2x256xf32> to vector<2x32xf32>
    %113 = vector.extract_strided_slice %101 {offsets = [0, 32], sizes = [2, 32], strides = [1, 1]} : vector<2x256xf32> to vector<2x32xf32>
    %114 = vector.extract_strided_slice %102 {offsets = [0, 64], sizes = [2, 32], strides = [1, 1]} : vector<2x256xf32> to vector<2x32xf32>
    %115 = vector.extract_strided_slice %101 {offsets = [0, 96], sizes = [2, 32], strides = [1, 1]} : vector<2x256xf32> to vector<2x32xf32>
    %116 = arith.mulf %113, %88 : vector<2x32xf32>
    %117 = arith.mulf %112, %114 : vector<2x32xf32>
    %118 = arith.addf %116, %117 : vector<2x32xf32>
    %119 = math.tanh %118 : vector<2x32xf32>
    %120 = arith.mulf %115, %119 : vector<2x32xf32>
    %cst_45 = arith.constant dense<0.000000e+00> : vector<2x256xf32>
    %121 = tpu.matmul %120, %0, %cst_45 {dimension_numbers = #tpu.dot_dimension_numbers<[1], [0], [0], [1], [0, 0, 1, 1], [], []>} : vector<2x32xf32>, vector<32x256xf32>, vector<2x256xf32> -> vector<2x256xf32>
    %cst_46 = arith.constant dense<0.000000e+00> : vector<2x256xf32>
    %122 = tpu.matmul %111, %1, %cst_46 {dimension_numbers = #tpu.dot_dimension_numbers<[1], [0], [0], [1], [0, 0, 1, 1], [], []>} : vector<2x32xf32>, vector<32x256xf32>, vector<2x256xf32> -> vector<2x256xf32>
    %123 = arith.addf %121, %122 : vector<2x256xf32>
    %c3_47 = arith.constant 3 : index
    %c0_48 = arith.constant 0 : index
    %c0_49 = arith.constant 0 : index
    %124 = vector.load %arg9[%c3_47, %c0_48, %c0_49] : memref<8x2x256xf32, #tpu.memory_space<vmem>>, vector<1x2x256xf32>
    %125 = vector.shape_cast %124 : vector<1x2x256xf32> to vector<2x256xf32>
    %126 = arith.addf %123, %125 : vector<2x256xf32>
    %127 = arith.negf %126 : vector<2x256xf32>
    %128 = math.exp %127 : vector<2x256xf32>
    %cst_50 = arith.constant 1.000000e+00 : f32
    %129 = vector.broadcast %cst_50 : f32 to vector<2x256xf32>
    %130 = arith.addf %129, %128 : vector<2x256xf32>
    %131 = arith.divf %129, %130 : vector<2x256xf32>
    %132 = math.tanh %126 : vector<2x256xf32>
    %133 = vector.extract_strided_slice %131 {offsets = [0, 128], sizes = [2, 32], strides = [1, 1]} : vector<2x256xf32> to vector<2x32xf32>
    %134 = vector.extract_strided_slice %131 {offsets = [0, 160], sizes = [2, 32], strides = [1, 1]} : vector<2x256xf32> to vector<2x32xf32>
    %135 = vector.extract_strided_slice %132 {offsets = [0, 192], sizes = [2, 32], strides = [1, 1]} : vector<2x256xf32> to vector<2x32xf32>
    %136 = vector.extract_strided_slice %131 {offsets = [0, 224], sizes = [2, 32], strides = [1, 1]} : vector<2x256xf32> to vector<2x32xf32>
    %137 = arith.mulf %134, %109 : vector<2x32xf32>
    %138 = arith.mulf %133, %135 : vector<2x32xf32>
    %139 = arith.addf %137, %138 : vector<2x32xf32>
    %140 = math.tanh %139 : vector<2x32xf32>
    %141 = arith.mulf %136, %140 : vector<2x32xf32>
    %142 = vector.extract_strided_slice %131 {offsets = [0, 0], sizes = [2, 32], strides = [1, 1]} : vector<2x256xf32> to vector<2x32xf32>
    %143 = vector.extract_strided_slice %131 {offsets = [0, 32], sizes = [2, 32], strides = [1, 1]} : vector<2x256xf32> to vector<2x32xf32>
    %144 = vector.extract_strided_slice %132 {offsets = [0, 64], sizes = [2, 32], strides = [1, 1]} : vector<2x256xf32> to vector<2x32xf32>
    %145 = vector.extract_strided_slice %131 {offsets = [0, 96], sizes = [2, 32], strides = [1, 1]} : vector<2x256xf32> to vector<2x32xf32>
    %146 = arith.mulf %143, %118 : vector<2x32xf32>
    %147 = arith.mulf %142, %144 : vector<2x32xf32>
    %148 = arith.addf %146, %147 : vector<2x32xf32>
    %149 = math.tanh %148 : vector<2x32xf32>
    %150 = arith.mulf %145, %149 : vector<2x32xf32>
    %cst_51 = arith.constant dense<0.000000e+00> : vector<2x256xf32>
    %151 = tpu.matmul %150, %0, %cst_51 {dimension_numbers = #tpu.dot_dimension_numbers<[1], [0], [0], [1], [0, 0, 1, 1], [], []>} : vector<2x32xf32>, vector<32x256xf32>, vector<2x256xf32> -> vector<2x256xf32>
    %cst_52 = arith.constant dense<0.000000e+00> : vector<2x256xf32>
    %152 = tpu.matmul %141, %1, %cst_52 {dimension_numbers = #tpu.dot_dimension_numbers<[1], [0], [0], [1], [0, 0, 1, 1], [], []>} : vector<2x32xf32>, vector<32x256xf32>, vector<2x256xf32> -> vector<2x256xf32>
    %153 = arith.addf %151, %152 : vector<2x256xf32>
    %c4_53 = arith.constant 4 : index
    %c0_54 = arith.constant 0 : index
    %c0_55 = arith.constant 0 : index
    %154 = vector.load %arg9[%c4_53, %c0_54, %c0_55] : memref<8x2x256xf32, #tpu.memory_space<vmem>>, vector<1x2x256xf32>
    %155 = vector.shape_cast %154 : vector<1x2x256xf32> to vector<2x256xf32>
    %156 = arith.addf %153, %155 : vector<2x256xf32>
    %157 = arith.negf %156 : vector<2x256xf32>
    %158 = math.exp %157 : vector<2x256xf32>
    %cst_56 = arith.constant 1.000000e+00 : f32
    %159 = vector.broadcast %cst_56 : f32 to vector<2x256xf32>
    %160 = arith.addf %159, %158 : vector<2x256xf32>
    %161 = arith.divf %159, %160 : vector<2x256xf32>
    %162 = math.tanh %156 : vector<2x256xf32>
    %163 = vector.extract_strided_slice %161 {offsets = [0, 128], sizes = [2, 32], strides = [1, 1]} : vector<2x256xf32> to vector<2x32xf32>
    %164 = vector.extract_strided_slice %161 {offsets = [0, 160], sizes = [2, 32], strides = [1, 1]} : vector<2x256xf32> to vector<2x32xf32>
    %165 = vector.extract_strided_slice %162 {offsets = [0, 192], sizes = [2, 32], strides = [1, 1]} : vector<2x256xf32> to vector<2x32xf32>
    %166 = vector.extract_strided_slice %161 {offsets = [0, 224], sizes = [2, 32], strides = [1, 1]} : vector<2x256xf32> to vector<2x32xf32>
    %167 = arith.mulf %164, %139 : vector<2x32xf32>
    %168 = arith.mulf %163, %165 : vector<2x32xf32>
    %169 = arith.addf %167, %168 : vector<2x32xf32>
    %170 = math.tanh %169 : vector<2x32xf32>
    %171 = arith.mulf %166, %170 : vector<2x32xf32>
    %172 = vector.extract_strided_slice %161 {offsets = [0, 0], sizes = [2, 32], strides = [1, 1]} : vector<2x256xf32> to vector<2x32xf32>
    %173 = vector.extract_strided_slice %161 {offsets = [0, 32], sizes = [2, 32], strides = [1, 1]} : vector<2x256xf32> to vector<2x32xf32>
    %174 = vector.extract_strided_slice %162 {offsets = [0, 64], sizes = [2, 32], strides = [1, 1]} : vector<2x256xf32> to vector<2x32xf32>
    %175 = vector.extract_strided_slice %161 {offsets = [0, 96], sizes = [2, 32], strides = [1, 1]} : vector<2x256xf32> to vector<2x32xf32>
    %176 = arith.mulf %173, %148 : vector<2x32xf32>
    %177 = arith.mulf %172, %174 : vector<2x32xf32>
    %178 = arith.addf %176, %177 : vector<2x32xf32>
    %179 = math.tanh %178 : vector<2x32xf32>
    %180 = arith.mulf %175, %179 : vector<2x32xf32>
    %cst_57 = arith.constant dense<0.000000e+00> : vector<2x256xf32>
    %181 = tpu.matmul %180, %0, %cst_57 {dimension_numbers = #tpu.dot_dimension_numbers<[1], [0], [0], [1], [0, 0, 1, 1], [], []>} : vector<2x32xf32>, vector<32x256xf32>, vector<2x256xf32> -> vector<2x256xf32>
    %cst_58 = arith.constant dense<0.000000e+00> : vector<2x256xf32>
    %182 = tpu.matmul %171, %1, %cst_58 {dimension_numbers = #tpu.dot_dimension_numbers<[1], [0], [0], [1], [0, 0, 1, 1], [], []>} : vector<2x32xf32>, vector<32x256xf32>, vector<2x256xf32> -> vector<2x256xf32>
    %183 = arith.addf %181, %182 : vector<2x256xf32>
    %c5_59 = arith.constant 5 : index
    %c0_60 = arith.constant 0 : index
    %c0_61 = arith.constant 0 : index
    %184 = vector.load %arg9[%c5_59, %c0_60, %c0_61] : memref<8x2x256xf32, #tpu.memory_space<vmem>>, vector<1x2x256xf32>
    %185 = vector.shape_cast %184 : vector<1x2x256xf32> to vector<2x256xf32>
    %186 = arith.addf %183, %185 : vector<2x256xf32>
    %187 = arith.negf %186 : vector<2x256xf32>
    %188 = math.exp %187 : vector<2x256xf32>
    %cst_62 = arith.constant 1.000000e+00 : f32
    %189 = vector.broadcast %cst_62 : f32 to vector<2x256xf32>
    %190 = arith.addf %189, %188 : vector<2x256xf32>
    %191 = arith.divf %189, %190 : vector<2x256xf32>
    %192 = math.tanh %186 : vector<2x256xf32>
    %193 = vector.extract_strided_slice %191 {offsets = [0, 128], sizes = [2, 32], strides = [1, 1]} : vector<2x256xf32> to vector<2x32xf32>
    %194 = vector.extract_strided_slice %191 {offsets = [0, 160], sizes = [2, 32], strides = [1, 1]} : vector<2x256xf32> to vector<2x32xf32>
    %195 = vector.extract_strided_slice %192 {offsets = [0, 192], sizes = [2, 32], strides = [1, 1]} : vector<2x256xf32> to vector<2x32xf32>
    %196 = vector.extract_strided_slice %191 {offsets = [0, 224], sizes = [2, 32], strides = [1, 1]} : vector<2x256xf32> to vector<2x32xf32>
    %197 = arith.mulf %194, %169 : vector<2x32xf32>
    %198 = arith.mulf %193, %195 : vector<2x32xf32>
    %199 = arith.addf %197, %198 : vector<2x32xf32>
    %200 = math.tanh %199 : vector<2x32xf32>
    %201 = arith.mulf %196, %200 : vector<2x32xf32>
    %202 = vector.extract_strided_slice %191 {offsets = [0, 0], sizes = [2, 32], strides = [1, 1]} : vector<2x256xf32> to vector<2x32xf32>
    %203 = vector.extract_strided_slice %191 {offsets = [0, 32], sizes = [2, 32], strides = [1, 1]} : vector<2x256xf32> to vector<2x32xf32>
    %204 = vector.extract_strided_slice %192 {offsets = [0, 64], sizes = [2, 32], strides = [1, 1]} : vector<2x256xf32> to vector<2x32xf32>
    %205 = vector.extract_strided_slice %191 {offsets = [0, 96], sizes = [2, 32], strides = [1, 1]} : vector<2x256xf32> to vector<2x32xf32>
    %206 = arith.mulf %203, %178 : vector<2x32xf32>
    %207 = arith.mulf %202, %204 : vector<2x32xf32>
    %208 = arith.addf %206, %207 : vector<2x32xf32>
    %209 = math.tanh %208 : vector<2x32xf32>
    %210 = arith.mulf %205, %209 : vector<2x32xf32>
    %cst_63 = arith.constant dense<0.000000e+00> : vector<2x256xf32>
    %211 = tpu.matmul %210, %0, %cst_63 {dimension_numbers = #tpu.dot_dimension_numbers<[1], [0], [0], [1], [0, 0, 1, 1], [], []>} : vector<2x32xf32>, vector<32x256xf32>, vector<2x256xf32> -> vector<2x256xf32>
    %cst_64 = arith.constant dense<0.000000e+00> : vector<2x256xf32>
    %212 = tpu.matmul %201, %1, %cst_64 {dimension_numbers = #tpu.dot_dimension_numbers<[1], [0], [0], [1], [0, 0, 1, 1], [], []>} : vector<2x32xf32>, vector<32x256xf32>, vector<2x256xf32> -> vector<2x256xf32>
    %213 = arith.addf %211, %212 : vector<2x256xf32>
    %c6_65 = arith.constant 6 : index
    %c0_66 = arith.constant 0 : index
    %c0_67 = arith.constant 0 : index
    %214 = vector.load %arg9[%c6_65, %c0_66, %c0_67] : memref<8x2x256xf32, #tpu.memory_space<vmem>>, vector<1x2x256xf32>
    %215 = vector.shape_cast %214 : vector<1x2x256xf32> to vector<2x256xf32>
    %216 = arith.addf %213, %215 : vector<2x256xf32>
    %217 = arith.negf %216 : vector<2x256xf32>
    %218 = math.exp %217 : vector<2x256xf32>
    %cst_68 = arith.constant 1.000000e+00 : f32
    %219 = vector.broadcast %cst_68 : f32 to vector<2x256xf32>
    %220 = arith.addf %219, %218 : vector<2x256xf32>
    %221 = arith.divf %219, %220 : vector<2x256xf32>
    %222 = math.tanh %216 : vector<2x256xf32>
    %223 = vector.extract_strided_slice %221 {offsets = [0, 128], sizes = [2, 32], strides = [1, 1]} : vector<2x256xf32> to vector<2x32xf32>
    %224 = vector.extract_strided_slice %221 {offsets = [0, 160], sizes = [2, 32], strides = [1, 1]} : vector<2x256xf32> to vector<2x32xf32>
    %225 = vector.extract_strided_slice %222 {offsets = [0, 192], sizes = [2, 32], strides = [1, 1]} : vector<2x256xf32> to vector<2x32xf32>
    %226 = vector.extract_strided_slice %221 {offsets = [0, 224], sizes = [2, 32], strides = [1, 1]} : vector<2x256xf32> to vector<2x32xf32>
    %227 = arith.mulf %224, %199 : vector<2x32xf32>
    %228 = arith.mulf %223, %225 : vector<2x32xf32>
    %229 = arith.addf %227, %228 : vector<2x32xf32>
    %230 = math.tanh %229 : vector<2x32xf32>
    %231 = arith.mulf %226, %230 : vector<2x32xf32>
    %232 = vector.extract_strided_slice %221 {offsets = [0, 0], sizes = [2, 32], strides = [1, 1]} : vector<2x256xf32> to vector<2x32xf32>
    %233 = vector.extract_strided_slice %221 {offsets = [0, 32], sizes = [2, 32], strides = [1, 1]} : vector<2x256xf32> to vector<2x32xf32>
    %234 = vector.extract_strided_slice %222 {offsets = [0, 64], sizes = [2, 32], strides = [1, 1]} : vector<2x256xf32> to vector<2x32xf32>
    %235 = vector.extract_strided_slice %221 {offsets = [0, 96], sizes = [2, 32], strides = [1, 1]} : vector<2x256xf32> to vector<2x32xf32>
    %236 = arith.mulf %233, %208 : vector<2x32xf32>
    %237 = arith.mulf %232, %234 : vector<2x32xf32>
    %238 = arith.addf %236, %237 : vector<2x32xf32>
    %239 = math.tanh %238 : vector<2x32xf32>
    %240 = arith.mulf %235, %239 : vector<2x32xf32>
    %cst_69 = arith.constant dense<0.000000e+00> : vector<2x256xf32>
    %241 = tpu.matmul %240, %0, %cst_69 {dimension_numbers = #tpu.dot_dimension_numbers<[1], [0], [0], [1], [0, 0, 1, 1], [], []>} : vector<2x32xf32>, vector<32x256xf32>, vector<2x256xf32> -> vector<2x256xf32>
    %cst_70 = arith.constant dense<0.000000e+00> : vector<2x256xf32>
    %242 = tpu.matmul %231, %1, %cst_70 {dimension_numbers = #tpu.dot_dimension_numbers<[1], [0], [0], [1], [0, 0, 1, 1], [], []>} : vector<2x32xf32>, vector<32x256xf32>, vector<2x256xf32> -> vector<2x256xf32>
    %243 = arith.addf %241, %242 : vector<2x256xf32>
    %c7_71 = arith.constant 7 : index
    %c0_72 = arith.constant 0 : index
    %c0_73 = arith.constant 0 : index
    %244 = vector.load %arg9[%c7_71, %c0_72, %c0_73] : memref<8x2x256xf32, #tpu.memory_space<vmem>>, vector<1x2x256xf32>
    %245 = vector.shape_cast %244 : vector<1x2x256xf32> to vector<2x256xf32>
    %246 = arith.addf %243, %245 : vector<2x256xf32>
    %247 = arith.negf %246 : vector<2x256xf32>
    %248 = math.exp %247 : vector<2x256xf32>
    %cst_74 = arith.constant 1.000000e+00 : f32
    %249 = vector.broadcast %cst_74 : f32 to vector<2x256xf32>
    %250 = arith.addf %249, %248 : vector<2x256xf32>
    %251 = arith.divf %249, %250 : vector<2x256xf32>
    %252 = math.tanh %246 : vector<2x256xf32>
    %253 = vector.extract_strided_slice %251 {offsets = [0, 128], sizes = [2, 32], strides = [1, 1]} : vector<2x256xf32> to vector<2x32xf32>
    %254 = vector.extract_strided_slice %251 {offsets = [0, 160], sizes = [2, 32], strides = [1, 1]} : vector<2x256xf32> to vector<2x32xf32>
    %255 = vector.extract_strided_slice %252 {offsets = [0, 192], sizes = [2, 32], strides = [1, 1]} : vector<2x256xf32> to vector<2x32xf32>
    %256 = vector.extract_strided_slice %251 {offsets = [0, 224], sizes = [2, 32], strides = [1, 1]} : vector<2x256xf32> to vector<2x32xf32>
    %257 = arith.mulf %254, %229 : vector<2x32xf32>
    %258 = arith.mulf %253, %255 : vector<2x32xf32>
    %259 = arith.addf %257, %258 : vector<2x32xf32>
    %260 = math.tanh %259 : vector<2x32xf32>
    %261 = arith.mulf %256, %260 : vector<2x32xf32>
    %262 = vector.extract_strided_slice %251 {offsets = [0, 0], sizes = [2, 32], strides = [1, 1]} : vector<2x256xf32> to vector<2x32xf32>
    %263 = vector.extract_strided_slice %251 {offsets = [0, 32], sizes = [2, 32], strides = [1, 1]} : vector<2x256xf32> to vector<2x32xf32>
    %264 = vector.extract_strided_slice %252 {offsets = [0, 64], sizes = [2, 32], strides = [1, 1]} : vector<2x256xf32> to vector<2x32xf32>
    %265 = vector.extract_strided_slice %251 {offsets = [0, 96], sizes = [2, 32], strides = [1, 1]} : vector<2x256xf32> to vector<2x32xf32>
    %266 = arith.mulf %263, %238 : vector<2x32xf32>
    %267 = arith.mulf %262, %264 : vector<2x32xf32>
    %268 = arith.addf %266, %267 : vector<2x32xf32>
    %269 = math.tanh %268 : vector<2x32xf32>
    %270 = arith.mulf %265, %269 : vector<2x32xf32>
    %cst_75 = arith.constant dense<0.000000e+00> : vector<2x256xf32>
    %271 = tpu.matmul %270, %0, %cst_75 {dimension_numbers = #tpu.dot_dimension_numbers<[1], [0], [0], [1], [0, 0, 1, 1], [], []>} : vector<2x32xf32>, vector<32x256xf32>, vector<2x256xf32> -> vector<2x256xf32>
    %cst_76 = arith.constant dense<0.000000e+00> : vector<2x256xf32>
    %272 = tpu.matmul %261, %1, %cst_76 {dimension_numbers = #tpu.dot_dimension_numbers<[1], [0], [0], [1], [0, 0, 1, 1], [], []>} : vector<2x32xf32>, vector<32x256xf32>, vector<2x256xf32> -> vector<2x256xf32>
    %273 = arith.addf %271, %272 : vector<2x256xf32>
    %c7_77 = arith.constant 7 : index
    %c0_78 = arith.constant 0 : index
    %c0_79 = arith.constant 0 : index
    %274 = vector.load %arg9[%c7_77, %c0_78, %c0_79] : memref<8x2x256xf32, #tpu.memory_space<vmem>>, vector<1x2x256xf32>
    %275 = vector.shape_cast %274 : vector<1x2x256xf32> to vector<2x256xf32>
    %276 = arith.addf %273, %275 : vector<2x256xf32>
    %277 = arith.negf %276 : vector<2x256xf32>
    %278 = math.exp %277 : vector<2x256xf32>
    %cst_80 = arith.constant 1.000000e+00 : f32
    %279 = vector.broadcast %cst_80 : f32 to vector<2x256xf32>
    %280 = arith.addf %279, %278 : vector<2x256xf32>
    %281 = arith.divf %279, %280 : vector<2x256xf32>
    %282 = math.tanh %276 : vector<2x256xf32>
    %283 = vector.extract_strided_slice %281 {offsets = [0, 128], sizes = [2, 32], strides = [1, 1]} : vector<2x256xf32> to vector<2x32xf32>
    %284 = vector.extract_strided_slice %281 {offsets = [0, 160], sizes = [2, 32], strides = [1, 1]} : vector<2x256xf32> to vector<2x32xf32>
    %285 = vector.extract_strided_slice %282 {offsets = [0, 192], sizes = [2, 32], strides = [1, 1]} : vector<2x256xf32> to vector<2x32xf32>
    %286 = vector.extract_strided_slice %281 {offsets = [0, 224], sizes = [2, 32], strides = [1, 1]} : vector<2x256xf32> to vector<2x32xf32>
    %287 = arith.mulf %284, %259 : vector<2x32xf32>
    %288 = arith.mulf %283, %285 : vector<2x32xf32>
    %289 = arith.addf %287, %288 : vector<2x32xf32>
    %290 = math.tanh %289 : vector<2x32xf32>
    %291 = arith.mulf %286, %290 : vector<2x32xf32>
    %c0_81 = arith.constant 0 : index
    %c0_82 = arith.constant 0 : index
    %292 = vector.load %arg5[%c0_81, %c0_82] : memref<32x128xf32, #tpu.memory_space<vmem>>, vector<32x128xf32>
    %cst_83 = arith.constant dense<0.000000e+00> : vector<2x128xf32>
    %293 = tpu.matmul %291, %292, %cst_83 {dimension_numbers = #tpu.dot_dimension_numbers<[1], [0], [0], [1], [0, 0, 1, 1], [], []>} : vector<2x32xf32>, vector<32x128xf32>, vector<2x128xf32> -> vector<2x128xf32>
    %c0_84 = arith.constant 0 : index
    %c0_85 = arith.constant 0 : index
    %294 = vector.load %arg6[%c0_84, %c0_85] : memref<1x128xf32, #tpu.memory_space<vmem>>, vector<1x128xf32>
    %295 = vector.broadcast %294 : vector<1x128xf32> to vector<2x128xf32>
    %296 = arith.addf %293, %295 : vector<2x128xf32>
    %c0_86 = arith.constant 0 : index
    %c0_87 = arith.constant 0 : index
    %297 = vector.load %arg7[%c0_86, %c0_87] : memref<1x128xf32, #tpu.memory_space<vmem>>, vector<1x128xf32>
    %cst_88 = arith.constant 0.000000e+00 : f32
    %298 = vector.broadcast %cst_88 : f32 to vector<1x128xf32>
    %299 = arith.cmpf one, %297, %298 : vector<1x128xf32>
    %300 = vector.shape_cast %299 : vector<1x128xi1> to vector<1x128xi1>
    %301 = vector.broadcast %300 : vector<1x128xi1> to vector<2x128xi1>
    %cst_89 = arith.constant 0.000000e+00 : f32
    %302 = vector.broadcast %cst_89 : f32 to vector<2x128xf32>
    %303 = arith.maximumf %296, %302 : vector<2x128xf32>
    %304 = vector.broadcast %cst_89 : f32 to vector<2x128xf32>
    %305 = arith.subf %296, %304 : vector<2x128xf32>
    %306 = arith.cmpf one, %305, %305 : vector<2x128xf32>
    %307 = vector.broadcast %cst_89 : f32 to vector<2x128xf32>
    %308 = arith.addf %296, %307 : vector<2x128xf32>
    %309 = math.absf %305 : vector<2x128xf32>
    %cst_90 = arith.constant 0.000000e+00 : f32
    %310 = vector.broadcast %cst_90 : f32 to vector<2x128xf32>
    %311 = arith.subf %310, %309 : vector<2x128xf32>
    %312 = math.exp %311 : vector<2x128xf32>
    %313 = math.log1p %312 : vector<2x128xf32>
    %314 = arith.addf %303, %313 : vector<2x128xf32>
    %315 = arith.select %306, %308, %314 : vector<2x128xi1>, vector<2x128xf32>
    %cst_91 = arith.constant 1.000000e-03 : f32
    %316 = vector.broadcast %cst_91 : f32 to vector<2x128xf32>
    %317 = arith.addf %315, %316 : vector<2x128xf32>
    %318 = arith.select %301, %317, %296 : vector<2x128xi1>, vector<2x128xf32>
    %c0_92 = arith.constant 0 : index
    %c0_93 = arith.constant 0 : index
    %319 = vector.load %arg8[%c0_92, %c0_93] : memref<2x128xf32, #tpu.memory_space<vmem>>, vector<2x128xf32>
    tpu.vector_store %arg8[%c0_92, %c0_93], %318 {strides = array<i32>} : memref<2x128xf32, #tpu.memory_space<vmem>>, vector<2x128xf32>,
    return
  }
}

</mosaic_0001>

<bundles_post_ra>
// kernel: tpu_custom_call.1
= control target key start
LH: loop header
LB: loop body
LE: loop exit
PB: predicated region body
PF: predicated region fallthrough
CT: control target
= control target key end

     0   :  { %13 = vsyncpa [#allocation4], 0  ;;  %s2889_s0 = inlined_call_operand.vmem [shape: f32[16,8], index: 0, kind: input, shape index: {}]   ;;  %s2890_s1 = inlined_call_operand.hbm [shape: f32[8,256], index: 1, kind: input, shape index: {}]   ;;  %s2891_s2 = inlined_call_operand.vmem [shape: f32[1,256], index: 2, kind: input, shape index: {}]   ;;  %s2892_s3 = inlined_call_operand.hbm [shape: f32[32,256], index: 3, kind: input, shape index: {}]   ;;  %s2893_s4 = inlined_call_operand.hbm [shape: f32[32,256], index: 4, kind: input, shape index: {}]   ;;  %s2894_s5 = inlined_call_operand.vmem [shape: f32[32,128], index: 5, kind: input, shape index: {}]   ;;  %s2895_s6 = inlined_call_operand.vmem [shape: f32[1,128], index: 6, kind: input, shape index: {}]   ;;  %s2896_s7 = inlined_call_operand.vmem [shape: f32[1,128], index: 7, kind: input, shape index: {}]   ;;  %s2897_s8 = inlined_call_operand.hbm [shape: f32[2,128], index: 8, kind: output, shape index: {}]  }
   0x1   :  { %14 = vsyncpa [#allocation7], 0 }
   0x2   :  { %15 = vsyncpa [#allocation5], 0  ;;  %s2532_s27 = smov [#allocation6]   ;;  %s2438_s9 = scalar_lea.hbm %s2892_s3, 1024 }
   0x3   :  { %s35_s28 = sshll.u32 %s2532_s27, 4  ;;  %p2439_p0 = scmp.ne.s32.totalorder %s2892_s3, %s2438_s9  ;;  %s36_s28 = int_to_ptr.vmem [resolvable:$true] %s35_s28 }
   0x4   :  { %p2442_p1 = scmp.lt.u32.totalorder %s2438_s9, %s2892_s3 }
   0x6   :  { %p2444_p2 = pnand %p2442_p1, %p2439_p0 }
   0x8   :  { %2447 = shalt.err (!%p2444_p2)
}
   0x9   :  { %s2448_s14 = scalar_lea.vmem %s36_s28, 1024  ;;  %p2453_p4 = scmp.lt.s32.totalorder %s36_s28, %s36_s28 }
   0xa   :  { %p2449_p3 = scmp.ne.s32.totalorder %s36_s28, %s2448_s14  ;;  %p2454_p5 = scmp.lt.s32.totalorder %s2448_s14, %s2448_s14 }
   0xc   :  { %p2455_p6 = por %p2454_p5, %p2453_p4 }
   0xe   :  { %p2456_p7 = pnand %p2455_p6, %p2449_p3 }
  0x10   :  { %2459 = shalt.err (!%p2456_p7)
}
  0x11   :  { %s2533_s15 = smov 256   ;;  %s2534_s16 = smov 16  }
  0x12   :  { %41 = dma.hbm_to_vmem [thread:$0]  %s2892_s3, 1024, %s36_s28, [#allocation7], %s2533_s15, %s2533_s15, %s2534_s16  }
  0x13   :  { %s2535_s19 = smov [#allocation3]   ;;  %s2536_s21 = smov [#allocation8]  }
  0x14   :  { %s24_s20 = sshll.u32 %s2535_s19, 4  ;;  %s47_s22 = sshll.u32 %s2536_s21, 4  ;;  %s25_s20 = int_to_ptr.vmem [resolvable:$true] %s24_s20  ;;  %s48_s22 = int_to_ptr.vmem [resolvable:$true] %s47_s22 }
  0x15   :  { %s2460_s25 = scalar_lea.hbm %s2890_s1, 256 }
  0x16   :  { %p2461_p8 = scmp.ne.s32.totalorder %s2890_s1, %s2460_s25  ;;  %p2464_p9 = scmp.lt.u32.totalorder %s2460_s25, %s2890_s1 }
  0x18   :  { %p2466_p10 = pnand %p2464_p9, %p2461_p8 }
  0x1a   :  { %2469 = shalt.err (!%p2466_p10)
}
  0x1b   :  { %s2470_s3 = scalar_lea.vmem %s25_s20, 256  ;;  %p2475_p12 = scmp.lt.s32.totalorder %s25_s20, %s25_s20 }
  0x1c   :  { %p2471_p11 = scmp.ne.s32.totalorder %s25_s20, %s2470_s3  ;;  %p2476_p13 = scmp.lt.s32.totalorder %s2470_s3, %s2470_s3 }
  0x1e   :  { %p2477_p0 = por %p2476_p13, %p2475_p12 }
  0x20   :  { %p2478_p1 = pnand %p2477_p0, %p2471_p11 }
  0x22   :  { %2481 = shalt.err (!%p2478_p1)
}
  0x23   :  { %27 = dma.hbm_to_vmem [thread:$0]  %s2890_s1, 256, %s25_s20, [#allocation4]  }
  0x24   :  { %s2482_s12 = scalar_lea.hbm %s2893_s4, 1024 }
  0x25   :  { %p2483_p2 = scmp.ne.s32.totalorder %s2893_s4, %s2482_s12  ;;  %p2486_p3 = scmp.lt.u32.totalorder %s2482_s12, %s2893_s4 }
  0x27   :  { %p2488_p4 = pnand %p2486_p3, %p2483_p2 }
  0x29   :  { %2491 = shalt.err (!%p2488_p4)
}
  0x2a   :  { %s2492_s19 = scalar_lea.vmem %s48_s22, 1024  ;;  %p2497_p6 = scmp.lt.s32.totalorder %s48_s22, %s48_s22 }
  0x2b   :  { %p2493_p5 = scmp.ne.s32.totalorder %s48_s22, %s2492_s19  ;;  %p2498_p7 = scmp.lt.s32.totalorder %s2492_s19, %s2492_s19 }
  0x2d   :  { %p2499_p8 = por %p2498_p7, %p2497_p6 }
  0x2f   :  { %p2500_p9 = pnand %p2499_p8, %p2493_p5 }
  0x31   :  { %2503 = shalt.err (!%p2500_p9)
}
  0x32   :  { %53 = dma.hbm_to_vmem [thread:$0]  %s2893_s4, 1024, %s48_s22, [#allocation7], %s2533_s15, %s2533_s15, %s2534_s16  }
  0x33   :  { %2526 = dma.done.wait [#allocation4], 256  }
  0x34   :  { %2527 = vsyncadd [#allocation4], 4294967040 }
  0x35   :  { %2528 = dma.done.wait [#allocation7], 2048  }
  0x36   :  { %2529 = vsyncadd [#allocation7], 4294965248  ;;  %v2537_v0 = vmov 0.0   ;;  %v88_v1 = vld [vmem:[#allocation3 + $0x8] sm:$0xff]  ;;  %v87_v2 = vld [vmem:[#allocation3] sm:$0xff]  ;;  %vm101_vm0 = vcmask 64512   ;;  %v91_v4 = vlaneseq }
  0x37   :  { %172 = vmatprep.mubr.f32.mxu0 %v2537_v0  ;;  %341 = vmatprep.mubr.f32.mxu1 %v2537_v0  ;;  %v85_v3 = vld [vmem:[%s2889_s0] sm:$0xff]  ;;  %v2538_v8 = vmov 1983009808   ;;  %s2540_s16 = smov 32   ;;  %v78_v36 = vld [vmem:[#allocation8 + $0x8] sm:$0xff]  ;;  %v80_v37 = vld [vmem:[#allocation8 + $0x18] sm:$0xff] }
  0x38   :  { %108 = vmatprep.subr.mxu0 %v88_v1  ;;  %v2639_v5 = vshrl.u32 %v91_v4, 7  ;;  %v89_v7 = vld [vmem:[%s2891_s2] sm:$0x3]  ;;  %v189_v9 = vunpack.c.l.s4 %v2538_v8  ;;  %s2539_s2 = smov 64   ;;  %v77_v38 = vld [vmem:[#allocation8] sm:$0xff]  ;;  %v2664_v39 = vpack.c.bf16 %v80_v37, %v78_v36  ;;  %v82_v41 = vld [vmem:[#allocation8 + $0x28] sm:$0xff] }
  0x39   :  { %109 = vmatpush1.msra.mxu0 %v87_v2  ;;  %v79_v40 = vld [vmem:[#allocation8 + $0x10] sm:$0xff]  ;;  %v84_v42 = vld [vmem:[#allocation8 + $0x38] sm:$0xff]  ;;  %v81_v45 = vld [vmem:[#allocation8 + $0x20] sm:$0xff]  ;;  %vm273_vm1 = vcmask 261120   ;;  %vm2542_vm2 = vmmov 0  }
  0x3a   :  { %2083 = vmatmul.mubr.msk.f32.vlgmr.msra.gmra.mrb[0].mxu0 %vm101_vm0, %v85_v3  ;;  %v93_v6 = vsub.s32 0, %v2639_v5  ;;  %v97_v10 = vsub.s32 1, %v2639_v5  ;;  %v190_v12 = vunpack.c.0.s8 %v189_v9  ;;  %v2666_v43 = vpack.c.bf16 %v79_v40, %v77_v38  ;;  %v83_v46 = vld [vmem:[#allocation8 + $0x30] sm:$0xff]  ;;  %v70_v47 = vld [vmem:[#allocation6 + $0x8] sm:$0xff]  ;;  %2146 = vmatprep.subr.bf16.mxu1 %v2664_v39  ;;  %v72_v48 = vld [vmem:[#allocation6 + $0x18] sm:$0xff] }
  0x3b   :  { %178 = vmatprep.mubr.f32.mxu0 %v2537_v0  ;;  %v2668_v44 = vpack.c.bf16 %v84_v42, %v82_v41  ;;  %2162 = vmatprep.subr.bf16.mxu0 %v2664_v39  ;;  %v2673_v49 = vpack.c.bf16 %v83_v46, %v81_v45  ;;  %v2677_v50 = vpack.c.bf16 %v72_v48, %v70_v47  ;;  %v69_v51 = vld [vmem:[#allocation6] sm:$0xff]  ;;  %v71_v52 = vld [vmem:[#allocation6 + $0x10] sm:$0xff]  ;;  %v74_v53 = vld [vmem:[#allocation6 + $0x28] sm:$0xff] }
  0x3c   :  { %v2648_v11 = vrot.slane %v89_v7, %v93_v6  ;;  %v2650_v13 = vrot.slane %v89_v7, %v97_v10  ;;  %v2654_v17 = vsub.s32 %v190_v12, %v2639_v5  ;;  %2148 = vmatpush1.bf16.msra.mxu1 %v2666_v43  ;;  %2164 = vmatpush1.bf16.msra.mxu0 %v2666_v43  ;;  %v76_v54 = vld [vmem:[#allocation6 + $0x38] sm:$0xff]  ;;  %v73_v58 = vld [vmem:[#allocation6 + $0x20] sm:$0xff]  ;;  %v75_v59 = vld [vmem:[#allocation6 + $0x30] sm:$0xff] }
  0x3d   :  { %2150 = vmatprep.subr.bf16.mxu1 %v2668_v44  ;;  %2166 = vmatprep.subr.bf16.mxu0 %v2668_v44  ;;  %v2681_v56 = vpack.c.bf16 %v71_v52, %v69_v51  ;;  %v2686_v57 = vpack.c.bf16 %v76_v54, %v74_v53  ;;  %v2691_v60 = vpack.c.bf16 %v75_v59, %v73_v58 }
  0x40   :  { %2152 = vmatpush1.bf16.msra.mxu1 %v2673_v49  ;;  %2168 = vmatpush1.bf16.msra.mxu0 %v2673_v49 }
  0x41   :  { %2154 = vmatprep.subr.bf16.mxu1 %v2677_v50  ;;  %2170 = vmatprep.subr.bf16.mxu0 %v2677_v50 }
  0x43   :  { %342 = vmatmul.mubr.f32.vlgmr.msra.gmra.mrb[0].mxu1 %v2537_v0 }
  0x44   :  { %2156 = vmatpush1.bf16.msra.mxu1 %v2681_v56  ;;  %424 = vmatprep.mubr.f32.mxu1 %v2537_v0 }
  0x45   :  { %2158 = vmatprep.subr.bf16.mxu1 %v2686_v57 }
  0x48   :  { %2160 = vmatpush1.bf16.msra.mxu1 %v2691_v60 }
  0x49   :  { %2178 = vmatprep.subr.bf16.mxu1 %v2664_v39 }
 0x10d   :  { %v174_v14 = vpop.f32.mrb[0].mxu0 }
 0x10e   :  { %v175_v15 = vadd.f32 %v174_v14, %v2648_v11  ;;  %v176_v16 = vpop.f32.mrb[1].mxu0 }
 0x10f   :  { %v177_v18 = vadd.f32 %v176_v16, %v2650_v13 }
 0x111   :  { %v187_v19 = vcombine.low %v175_v15, %v177_v18  ;;  %v201_v20 = vcombine.high %v175_v15, %v177_v18 }
 0x113   :  { %v194_v21 = vrot.slane %v187_v19, %v2654_v17  ;;  %2085 = vst.sshfl [vmem:[#allocation2] sm:$0x33 pattern:$0x76325410] %v187_v19  ;;  %v208_v22 = vrot.slane %v201_v20, %v2654_v17 }
 0x114   :  { %2086 = vst.sshfl [vmem:[#allocation2 + $0x8] sm:$0x33 pattern:$0x76325410] %v201_v20 }
 0x115   :  { %v197_v23 = vcombine.high %v194_v21, %v194_v21  ;;  %v212_v24 = vcombine.high %v208_v22, %v208_v22 }
 0x117   :  { %200 = vst [vmem:[#allocation2 + $0x4] sm:$0xf] %v197_v23  ;;  %215 = vst [vmem:[#allocation2 + $0xc] sm:$0xf] %v212_v24 }
 0x11a   :  { %v248_v25 = vld [vmem:[#allocation2] sm:$0xf] }
 0x11b   :  { %2306 = vtanh.f32 %v248_v25  ;;  %v2089_v27 = vmul.f32 -1.442695, %v248_v25 }
 0x11d   :  { %2308 = vpow2.f32 %v2089_v27 }
 0x11e   :  { %v2091_v2 = vld.sshfl [vmem:[#allocation2 + $0x4] sm:$0x33 pattern:$0x76325410] }
 0x11f   :  { %v440_v4 = vcombine.high %v2091_v2, %v2091_v2 }
 0x125   :  { %v2307_v26 = vpop.eup %2306 }
 0x126   :  { %258 = vrot.lane.b32.xlu0 %v2307_v26, %s2539_s2 }
 0x127   :  { %v2309_v28 = vpop.eup %2308 }
 0x128   :  { %v252_v29 = vadd.f32 1.0, %v2309_v28 }
 0x12a   :  { %2310 = vrcp.f32 %v252_v29 }
 0x134   :  { %v2311_v30 = vpop.eup %2310 }
 0x135   :  { %v256_v33 = vmul.f32 0.0, %v2311_v30 }
 0x198   :  { %v259_v31 = vpop.permute.xlu0 %258 }
 0x199   :  { %v261_v32 = vmul.f32 %v2311_v30, %v259_v31 }
 0x19b   :  { %263 = vrot.lane.b32.xlu0 %v261_v32, %s2540_s16 }
 0x20d   :  { %v264_v34 = vpop.permute.xlu0 %263 }
 0x20e   :  { %v2661_v35 = vadd.f32 %v264_v34, %v256_v33  ;;  %v86_v33 = vld [vmem:[%s2889_s0 + $0x8] sm:$0xff] }
 0x20f   :  { %2084 = vmatmul.mubr.msk.f32.gmra.mrb[2].mxu0 %vm101_vm0, %v86_v33  ;;  %v2101_v33 = vld.sshfl [vmem:[#allocation2 + $0xc] sm:$0x33 pattern:$0x76325410] }
 0x210   :  { %2312 = vtanh.f32 %v2661_v35  ;;  %562 = vmatprep.mubr.f32.mxu0 %v2537_v0 }
 0x21a   :  { %v2313_v55 = vpop.eup %2312 }
 0x21b   :  { %269 = vrot.lane.b32.xlu1 %v2313_v55, %s2539_s2 }
 0x28d   :  { %v270_v61 = vpop.permute.xlu1 %269 }
 0x28e   :  { %v272_v62 = vmul.f32 %v2311_v30, %v270_v61 }
 0x290   :  { %v355_v63 = vrot.slane %v272_v62, %v2654_v17 }
 0x292   :  { %356 = vrot.lane.b32.xlu1 %v355_v63, %s2540_s16 }
 0x2e2   :  { %v180_v41 = vpop.f32.mrb[2].mxu0 }
 0x2e3   :  { %v181_v42 = vadd.f32 %v180_v41, %v2648_v11  ;;  %v182_v45 = vpop.f32.mrb[3].mxu0 }
 0x2e4   :  { %v183_v46 = vadd.f32 %v182_v45, %v2650_v13  ;;  %v2096_v13 = vld.sshfl [vmem:[#allocation2 + $0x8] sm:$0x33 pattern:$0x76325410] }
 0x2e5   :  { %v654_v58 = vcombine.high %v2096_v13, %v2096_v13 }
 0x2e6   :  { %v218_v47 = vcombine.low %v181_v42, %v183_v46  ;;  %v233_v48 = vcombine.high %v181_v42, %v183_v46 }
 0x2e8   :  { %v225_v51 = vrot.slane %v218_v47, %v2654_v17  ;;  %2087 = vst.sshfl [vmem:[#allocation2 + $0x10] sm:$0x33 pattern:$0x76325410] %v218_v47  ;;  %v240_v52 = vrot.slane %v233_v48, %v2654_v17 }
 0x2e9   :  { %2088 = vst.sshfl [vmem:[#allocation2 + $0x18] sm:$0x33 pattern:$0x76325410] %v233_v48 }
 0x2ea   :  { %v229_v53 = vcombine.high %v225_v51, %v225_v51  ;;  %v244_v54 = vcombine.high %v240_v52, %v240_v52 }
 0x2ec   :  { %232 = vst [vmem:[#allocation2 + $0x14] sm:$0xf] %v229_v53  ;;  %247 = vst [vmem:[#allocation2 + $0x1c] sm:$0xf] %v244_v54 }
 0x304   :  { %v357_v1 = vpop.permute.xlu1 %356 }
 0x305   :  { %2090 = vmatmul.mubr.msk.f32.vlgmr.msra.gmra.mrb[0].mxu1 %vm273_vm1, %v357_v1 }
 0x306   :  { %2180 = vmatpush1.bf16.msra.mxu1 %v2666_v43  ;;  %776 = vmatprep.mubr.f32.mxu1 %v2537_v0 }
 0x307   :  { %2182 = vmatprep.subr.bf16.mxu1 %v2668_v44 }
 0x30a   :  { %2184 = vmatpush1.bf16.msra.mxu1 %v2673_v49 }
 0x30b   :  { %2186 = vmatprep.subr.bf16.mxu1 %v2677_v50 }
 0x3d8   :  { %v426_v3 = vpop.f32.mrb[0].mxu1 }
 0x3d9   :  { %v443_v7 = vadd.f32 %v2091_v2, %v426_v3  ;;  %v428_v8 = vpop.f32.mrb[1].mxu1 }
 0x3da   :  { %v444_v9 = vadd.f32 %v440_v4, %v428_v8 }
 0x3db   :  { %2314 = vtanh.f32 %v443_v7  ;;  %v2092_v14 = vmul.f32 -1.442695, %v443_v7 }
 0x3dc   :  { %2316 = vtanh.f32 %v444_v9  ;;  %v2093_v15 = vmul.f32 -1.442695, %v444_v9 }
 0x3dd   :  { %2318 = vpow2.f32 %v2092_v14 }
 0x3de   :  { %2320 = vpow2.f32 %v2093_v15 }
 0x3e5   :  { %v2315_v10 = vpop.eup %2314 }
 0x3e6   :  { %v2317_v12 = vpop.eup %2316  ;;  %478 = vrot.lane.b32.xlu1 %v2315_v10, %s2539_s2 }
 0x3e7   :  { %461 = vrot.lane.b32.xlu0 %v2317_v12, %s2539_s2  ;;  %v2319_v16 = vpop.eup %2318 }
 0x3e8   :  { %v2321_v18 = vpop.eup %2320  ;;  %v451_v19 = vadd.f32 1.0, %v2319_v16 }
 0x3e9   :  { %v452_v20 = vadd.f32 1.0, %v2321_v18 }
 0x3ea   :  { %2322 = vrcp.f32 %v451_v19 }
 0x3eb   :  { %2324 = vrcp.f32 %v452_v20 }
 0x3f4   :  { %v2323_v21 = vpop.eup %2322 }
 0x3f5   :  { %v2325_v23 = vpop.eup %2324  ;;  %v476_v27 = vmul.f32 %v2323_v21, %v2661_v35 }
 0x3f6   :  { %v459_v29 = vmul.f32 0.0, %v2325_v23 }
 0x458   :  { %v479_v22 = vpop.permute.xlu1 %478 }
 0x459   :  { %v481_v24 = vmul.f32 %v2323_v21, %v479_v22  ;;  %v462_v25 = vpop.permute.xlu0 %461 }
 0x45a   :  { %v464_v26 = vmul.f32 %v2325_v23, %v462_v25 }
 0x45b   :  { %483 = vrot.lane.b32.xlu1 %v481_v24, %s2540_s16 }
 0x45c   :  { %466 = vrot.lane.b32.xlu0 %v464_v26, %s2540_s16 }
 0x4cd   :  { %v484_v28 = vpop.permute.xlu1 %483 }
 0x4ce   :  { %v2710_v30 = vadd.f32 %v484_v28, %v476_v27  ;;  %v467_v31 = vpop.permute.xlu0 %466 }
 0x4cf   :  { %v2712_v32 = vadd.f32 %v467_v31, %v459_v29 }
 0x4d0   :  { %2326 = vtanh.f32 %v2710_v30 }
 0x4d1   :  { %2328 = vtanh.f32 %v2712_v32 }
 0x4da   :  { %v2327_v34 = vpop.eup %2326 }
 0x4db   :  { %v2329_v35 = vpop.eup %2328  ;;  %489 = vrot.lane.b32.xlu1 %v2327_v34, %s2539_s2 }
 0x4dc   :  { %472 = vrot.lane.b32.xlu0 %v2329_v35, %s2539_s2  ;;  %v868_v35 = vcombine.high %v2101_v33, %v2101_v33 }
 0x54d   :  { %v490_v36 = vpop.permute.xlu1 %489 }
 0x54e   :  { %v492_v37 = vmul.f32 %v2323_v21, %v490_v36  ;;  %v473_v38 = vpop.permute.xlu0 %472 }
 0x54f   :  { %v475_v40 = vmul.f32 %v2325_v23, %v473_v38 }
 0x550   :  { %570 = vrot.lane.b32.xlu1 %v492_v37, %s2540_s16 }
 0x551   :  { %494 = vrot.lane.b32.xlu0 %v475_v40, %s2540_s16 }
 0x5c2   :  { %v571_v11 = vpop.permute.xlu1 %570 }
 0x5c3   :  { %v495_v55 = vpop.permute.xlu0 %494 }
 0x5c4   :  { %2094 = vmatmul.mubr.msk.f32.vlgmr.msra.gmra.mrb[4].mxu0 %vm273_vm1, %v495_v55 }
 0x5c5   :  { %2172 = vmatpush1.bf16.msra.mxu0 %v2681_v56  ;;  %638 = vmatprep.mubr.f32.mxu0 %v2537_v0 }
 0x5c6   :  { %2174 = vmatprep.subr.bf16.mxu0 %v2686_v57 }
 0x5c9   :  { %2176 = vmatpush1.bf16.msra.mxu0 %v2691_v60 }
 0x5ca   :  { %2194 = vmatprep.subr.bf16.mxu0 %v2664_v39 }
 0x5cc   :  { %2095 = vmatmul.mubr.msk.f32.vlgmr.msra.gmra.mrb[4].mxu0 %vm273_vm1, %v571_v11 }
 0x5cd   :  { %2196 = vmatpush1.bf16.msra.mxu0 %v2666_v43  ;;  %990 = vmatprep.mubr.f32.mxu0 %v2537_v0 }
 0x5ce   :  { %2198 = vmatprep.subr.bf16.mxu0 %v2668_v44 }
 0x5d1   :  { %2200 = vmatpush1.bf16.msra.mxu0 %v2673_v49 }
 0x5d2   :  { %2202 = vmatprep.subr.bf16.mxu0 %v2677_v50 }
 0x69f   :  { %v640_v17 = vpop.f32.mrb[4].mxu0 }
 0x6a0   :  { %v657_v59 = vadd.f32 %v2096_v13, %v640_v17  ;;  %v642_v61 = vpop.f32.mrb[5].mxu0 }
 0x6a1   :  { %v658_v62 = vadd.f32 %v654_v58, %v642_v61 }
 0x6a2   :  { %2330 = vtanh.f32 %v657_v59  ;;  %v2097_v2 = vmul.f32 -1.442695, %v657_v59 }
 0x6a3   :  { %2332 = vtanh.f32 %v658_v62  ;;  %v2098_v3 = vmul.f32 -1.442695, %v658_v62 }
 0x6a4   :  { %2334 = vpow2.f32 %v2097_v2 }
 0x6a5   :  { %2336 = vpow2.f32 %v2098_v3 }
 0x6ac   :  { %v2331_v63 = vpop.eup %2330 }
 0x6ad   :  { %v2333_v1 = vpop.eup %2332  ;;  %692 = vrot.lane.b32.xlu1 %v2331_v63, %s2539_s2 }
 0x6ae   :  { %675 = vrot.lane.b32.xlu0 %v2333_v1, %s2539_s2  ;;  %v2335_v4 = vpop.eup %2334 }
 0x6af   :  { %v2337_v7 = vpop.eup %2336  ;;  %v665_v8 = vadd.f32 1.0, %v2335_v4 }
 0x6b0   :  { %v666_v9 = vadd.f32 1.0, %v2337_v7 }
 0x6b1   :  { %2338 = vrcp.f32 %v665_v8 }
 0x6b2   :  { %2340 = vrcp.f32 %v666_v9 }
 0x6bb   :  { %v2339_v10 = vpop.eup %2338 }
 0x6bc   :  { %v2341_v14 = vpop.eup %2340  ;;  %v690_v19 = vmul.f32 %v2339_v10, %v2710_v30 }
 0x6bd   :  { %v673_v21 = vmul.f32 %v2341_v14, %v2712_v32 }
 0x71f   :  { %v693_v12 = vpop.permute.xlu1 %692 }
 0x720   :  { %v695_v15 = vmul.f32 %v2339_v10, %v693_v12  ;;  %v676_v16 = vpop.permute.xlu0 %675  ;;  %v2106_v12 = vld.sshfl [vmem:[#allocation2 + $0x10] sm:$0x33 pattern:$0x76325410] }
 0x721   :  { %v678_v18 = vmul.f32 %v2341_v14, %v676_v16 }
 0x722   :  { %697 = vrot.lane.b32.xlu1 %v695_v15, %s2540_s16  ;;  %v1082_v15 = vcombine.high %v2106_v12, %v2106_v12 }
 0x723   :  { %680 = vrot.lane.b32.xlu0 %v678_v18, %s2540_s16 }
 0x794   :  { %v698_v20 = vpop.permute.xlu1 %697 }
 0x795   :  { %v700_v22 = vadd.f32 %v698_v20, %v690_v19  ;;  %v681_v23 = vpop.permute.xlu0 %680 }
 0x796   :  { %v683_v24 = vadd.f32 %v681_v23, %v673_v21 }
 0x797   :  { %2342 = vtanh.f32 %v700_v22 }
 0x798   :  { %2344 = vtanh.f32 %v683_v24 }
 0x7a1   :  { %v2343_v25 = vpop.eup %2342 }
 0x7a2   :  { %v2345_v26 = vpop.eup %2344  ;;  %703 = vrot.lane.b32.xlu1 %v2343_v25, %s2539_s2 }
 0x7a3   :  { %686 = vrot.lane.b32.xlu0 %v2345_v26, %s2539_s2 }
 0x814   :  { %v704_v27 = vpop.permute.xlu1 %703 }
 0x815   :  { %v706_v28 = vmul.f32 %v2339_v10, %v704_v27  ;;  %v687_v29 = vpop.permute.xlu0 %686 }
 0x816   :  { %v689_v31 = vmul.f32 %v2341_v14, %v687_v29 }
 0x817   :  { %784 = vrot.lane.b32.xlu1 %v706_v28, %s2540_s16 }
 0x818   :  { %708 = vrot.lane.b32.xlu0 %v689_v31, %s2540_s16 }
 0x889   :  { %v785_v32 = vpop.permute.xlu1 %784 }
 0x88a   :  { %v709_v30 = vpop.permute.xlu0 %708 }
 0x88b   :  { %2099 = vmatmul.mubr.msk.f32.vlgmr.msra.gmra.mrb[2].mxu1 %vm273_vm1, %v709_v30 }
 0x88c   :  { %2188 = vmatpush1.bf16.msra.mxu1 %v2681_v56  ;;  %852 = vmatprep.mubr.f32.mxu1 %v2537_v0 }
 0x88d   :  { %2190 = vmatprep.subr.bf16.mxu1 %v2686_v57 }
 0x890   :  { %2192 = vmatpush1.bf16.msra.mxu1 %v2691_v60 }
 0x891   :  { %2210 = vmatprep.subr.bf16.mxu1 %v2664_v39 }
 0x893   :  { %2100 = vmatmul.mubr.msk.f32.vlgmr.msra.gmra.mrb[2].mxu1 %vm273_vm1, %v785_v32 }
 0x894   :  { %2212 = vmatpush1.bf16.msra.mxu1 %v2666_v43  ;;  %1204 = vmatprep.mubr.f32.mxu1 %v2537_v0 }
 0x895   :  { %2214 = vmatprep.subr.bf16.mxu1 %v2668_v44 }
 0x898   :  { %2216 = vmatpush1.bf16.msra.mxu1 %v2673_v49 }
 0x899   :  { %2218 = vmatprep.subr.bf16.mxu1 %v2677_v50 }
 0x966   :  { %v854_v34 = vpop.f32.mrb[2].mxu1 }
 0x967   :  { %v871_v36 = vadd.f32 %v2101_v33, %v854_v34  ;;  %v856_v37 = vpop.f32.mrb[3].mxu1 }
 0x968   :  { %v872_v38 = vadd.f32 %v868_v35, %v856_v37 }
 0x969   :  { %2346 = vtanh.f32 %v871_v36  ;;  %v2102_v42 = vmul.f32 -1.442695, %v871_v36 }
 0x96a   :  { %2348 = vtanh.f32 %v872_v38  ;;  %v2103_v45 = vmul.f32 -1.442695, %v872_v38 }
 0x96b   :  { %2350 = vpow2.f32 %v2102_v42 }
 0x96c   :  { %2352 = vpow2.f32 %v2103_v45 }
 0x973   :  { %v2347_v40 = vpop.eup %2346 }
 0x974   :  { %v2349_v41 = vpop.eup %2348  ;;  %906 = vrot.lane.b32.xlu1 %v2347_v40, %s2539_s2 }
 0x975   :  { %889 = vrot.lane.b32.xlu0 %v2349_v41, %s2539_s2  ;;  %v2351_v46 = vpop.eup %2350 }
 0x976   :  { %v2353_v47 = vpop.eup %2352  ;;  %v879_v48 = vadd.f32 1.0, %v2351_v46 }
 0x977   :  { %v880_v51 = vadd.f32 1.0, %v2353_v47 }
 0x978   :  { %2354 = vrcp.f32 %v879_v48 }
 0x979   :  { %2356 = vrcp.f32 %v880_v51 }
 0x982   :  { %v2355_v52 = vpop.eup %2354 }
 0x983   :  { %v2357_v54 = vpop.eup %2356  ;;  %v904_v17 = vmul.f32 %v2355_v52, %v700_v22 }
 0x984   :  { %v887_v59 = vmul.f32 %v2357_v54, %v683_v24 }
 0x9e6   :  { %v907_v53 = vpop.permute.xlu1 %906 }
 0x9e7   :  { %v909_v55 = vmul.f32 %v2355_v52, %v907_v53  ;;  %v890_v11 = vpop.permute.xlu0 %889  ;;  %v2111_v53 = vld.sshfl [vmem:[#allocation2 + $0x14] sm:$0x33 pattern:$0x76325410] }
 0x9e8   :  { %v892_v13 = vmul.f32 %v2357_v54, %v890_v11 }
 0x9e9   :  { %911 = vrot.lane.b32.xlu1 %v909_v55, %s2540_s16  ;;  %v1296_v55 = vcombine.high %v2111_v53, %v2111_v53 }
 0x9ea   :  { %894 = vrot.lane.b32.xlu0 %v892_v13, %s2540_s16 }
 0xa5b   :  { %v912_v58 = vpop.permute.xlu1 %911 }
 0xa5c   :  { %v914_v61 = vadd.f32 %v912_v58, %v904_v17  ;;  %v895_v62 = vpop.permute.xlu0 %894 }
 0xa5d   :  { %v897_v63 = vadd.f32 %v895_v62, %v887_v59 }
 0xa5e   :  { %2358 = vtanh.f32 %v914_v61 }
 0xa5f   :  { %2360 = vtanh.f32 %v897_v63 }
 0xa68   :  { %v2359_v1 = vpop.eup %2358 }
 0xa69   :  { %v2361_v2 = vpop.eup %2360  ;;  %917 = vrot.lane.b32.xlu1 %v2359_v1, %s2539_s2 }
 0xa6a   :  { %900 = vrot.lane.b32.xlu0 %v2361_v2, %s2539_s2 }
 0xadb   :  { %v918_v3 = vpop.permute.xlu1 %917 }
 0xadc   :  { %v920_v4 = vmul.f32 %v2355_v52, %v918_v3  ;;  %v901_v7 = vpop.permute.xlu0 %900 }
 0xadd   :  { %v903_v8 = vmul.f32 %v2357_v54, %v901_v7 }
 0xade   :  { %998 = vrot.lane.b32.xlu1 %v920_v4, %s2540_s16 }
 0xadf   :  { %922 = vrot.lane.b32.xlu0 %v903_v8, %s2540_s16 }
 0xb50   :  { %v999_v10 = vpop.permute.xlu1 %998 }
 0xb51   :  { %v923_v9 = vpop.permute.xlu0 %922 }
 0xb52   :  { %2104 = vmatmul.mubr.msk.f32.vlgmr.msra.gmra.mrb[6].mxu0 %vm273_vm1, %v923_v9 }
 0xb53   :  { %2204 = vmatpush1.bf16.msra.mxu0 %v2681_v56  ;;  %1066 = vmatprep.mubr.f32.mxu0 %v2537_v0 }
 0xb54   :  { %2206 = vmatprep.subr.bf16.mxu0 %v2686_v57 }
 0xb57   :  { %2208 = vmatpush1.bf16.msra.mxu0 %v2691_v60 }
 0xb58   :  { %2226 = vmatprep.subr.bf16.mxu0 %v2664_v39 }
 0xb5a   :  { %2105 = vmatmul.mubr.msk.f32.vlgmr.msra.gmra.mrb[6].mxu0 %vm273_vm1, %v999_v10 }
 0xb5b   :  { %2228 = vmatpush1.bf16.msra.mxu0 %v2666_v43  ;;  %1418 = vmatprep.mubr.f32.mxu0 %v2537_v0 }
 0xb5c   :  { %2230 = vmatprep.subr.bf16.mxu0 %v2668_v44 }
 0xb5f   :  { %2232 = vmatpush1.bf16.msra.mxu0 %v2673_v49 }
 0xb60   :  { %2234 = vmatprep.subr.bf16.mxu0 %v2677_v50 }
 0xc2d   :  { %v1068_v14 = vpop.f32.mrb[6].mxu0 }
 0xc2e   :  { %v1085_v16 = vadd.f32 %v2106_v12, %v1068_v14  ;;  %v1070_v18 = vpop.f32.mrb[7].mxu0 }
 0xc2f   :  { %v1086_v19 = vadd.f32 %v1082_v15, %v1070_v18 }
 0xc30   :  { %2362 = vtanh.f32 %v1085_v16  ;;  %v2107_v22 = vmul.f32 -1.442695, %v1085_v16 }
 0xc31   :  { %2364 = vtanh.f32 %v1086_v19  ;;  %v2108_v23 = vmul.f32 -1.442695, %v1086_v19 }
 0xc32   :  { %2366 = vpow2.f32 %v2107_v22 }
 0xc33   :  { %2368 = vpow2.f32 %v2108_v23 }
 0xc3a   :  { %v2363_v20 = vpop.eup %2362 }
 0xc3b   :  { %v2365_v21 = vpop.eup %2364  ;;  %1120 = vrot.lane.b32.xlu1 %v2363_v20, %s2539_s2 }
 0xc3c   :  { %1103 = vrot.lane.b32.xlu0 %v2365_v21, %s2539_s2  ;;  %v2367_v24 = vpop.eup %2366 }
 0xc3d   :  { %v2369_v25 = vpop.eup %2368  ;;  %v1093_v26 = vadd.f32 1.0, %v2367_v24 }
 0xc3e   :  { %v1094_v27 = vadd.f32 1.0, %v2369_v25 }
 0xc3f   :  { %2370 = vrcp.f32 %v1093_v26 }
 0xc40   :  { %2372 = vrcp.f32 %v1094_v27 }
 0xc49   :  { %v2371_v28 = vpop.eup %2370 }
 0xc4a   :  { %v2373_v31 = vpop.eup %2372  ;;  %v1118_v34 = vmul.f32 %v2371_v28, %v914_v61 }
 0xc4b   :  { %v1101_v36 = vmul.f32 %v2373_v31, %v897_v63 }
 0xcad   :  { %v1121_v29 = vpop.permute.xlu1 %1120 }
 0xcae   :  { %v1123_v30 = vmul.f32 %v2371_v28, %v1121_v29  ;;  %v1104_v32 = vpop.permute.xlu0 %1103  ;;  %v2116_v29 = vld.sshfl [vmem:[#allocation2 + $0x18] sm:$0x33 pattern:$0x76325410] }
 0xcaf   :  { %v1106_v33 = vmul.f32 %v2373_v31, %v1104_v32 }
 0xcb0   :  { %1125 = vrot.lane.b32.xlu1 %v1123_v30, %s2540_s16  ;;  %v1510_v30 = vcombine.high %v2116_v29, %v2116_v29 }
 0xcb1   :  { %1108 = vrot.lane.b32.xlu0 %v1106_v33, %s2540_s16 }
 0xd22   :  { %v1126_v35 = vpop.permute.xlu1 %1125 }
 0xd23   :  { %v1128_v37 = vadd.f32 %v1126_v35, %v1118_v34  ;;  %v1109_v38 = vpop.permute.xlu0 %1108 }
 0xd24   :  { %v1111_v40 = vadd.f32 %v1109_v38, %v1101_v36 }
 0xd25   :  { %2374 = vtanh.f32 %v1128_v37 }
 0xd26   :  { %2376 = vtanh.f32 %v1111_v40 }
 0xd2f   :  { %v2375_v41 = vpop.eup %2374 }
 0xd30   :  { %v2377_v42 = vpop.eup %2376  ;;  %1131 = vrot.lane.b32.xlu1 %v2375_v41, %s2539_s2 }
 0xd31   :  { %1114 = vrot.lane.b32.xlu0 %v2377_v42, %s2539_s2 }
 0xda2   :  { %v1132_v45 = vpop.permute.xlu1 %1131 }
 0xda3   :  { %v1134_v46 = vmul.f32 %v2371_v28, %v1132_v45  ;;  %v1115_v47 = vpop.permute.xlu0 %1114 }
 0xda4   :  { %v1117_v48 = vmul.f32 %v2373_v31, %v1115_v47 }
 0xda5   :  { %1212 = vrot.lane.b32.xlu1 %v1134_v46, %s2540_s16 }
 0xda6   :  { %1136 = vrot.lane.b32.xlu0 %v1117_v48, %s2540_s16 }
 0xe17   :  { %v1213_v52 = vpop.permute.xlu1 %1212 }
 0xe18   :  { %v1137_v51 = vpop.permute.xlu0 %1136 }
 0xe19   :  { %2109 = vmatmul.mubr.msk.f32.vlgmr.msra.gmra.mrb[4].mxu1 %vm273_vm1, %v1137_v51 }
 0xe1a   :  { %2220 = vmatpush1.bf16.msra.mxu1 %v2681_v56  ;;  %1280 = vmatprep.mubr.f32.mxu1 %v2537_v0 }
 0xe1b   :  { %2222 = vmatprep.subr.bf16.mxu1 %v2686_v57 }
 0xe1e   :  { %2224 = vmatpush1.bf16.msra.mxu1 %v2691_v60 }
 0xe1f   :  { %2242 = vmatprep.subr.bf16.mxu1 %v2664_v39 }
 0xe21   :  { %2110 = vmatmul.mubr.msk.f32.vlgmr.msra.gmra.mrb[4].mxu1 %vm273_vm1, %v1213_v52 }
 0xe22   :  { %2244 = vmatpush1.bf16.msra.mxu1 %v2666_v43  ;;  %1632 = vmatprep.mubr.f32.mxu1 %v2537_v0 }
 0xe23   :  { %2246 = vmatprep.subr.bf16.mxu1 %v2668_v44 }
 0xe26   :  { %2248 = vmatpush1.bf16.msra.mxu1 %v2673_v49 }
 0xe27   :  { %2250 = vmatprep.subr.bf16.mxu1 %v2677_v50 }
 0xef4   :  { %v1282_v54 = vpop.f32.mrb[4].mxu1 }
 0xef5   :  { %v1299_v11 = vadd.f32 %v2111_v53, %v1282_v54  ;;  %v1284_v13 = vpop.f32.mrb[5].mxu1 }
 0xef6   :  { %v1300_v17 = vadd.f32 %v1296_v55, %v1284_v13 }
 0xef7   :  { %2378 = vtanh.f32 %v1299_v11  ;;  %v2112_v61 = vmul.f32 -1.442695, %v1299_v11 }
 0xef8   :  { %2380 = vtanh.f32 %v1300_v17  ;;  %v2113_v62 = vmul.f32 -1.442695, %v1300_v17 }
 0xef9   :  { %2382 = vpow2.f32 %v2112_v61 }
 0xefa   :  { %2384 = vpow2.f32 %v2113_v62 }
 0xf01   :  { %v2379_v58 = vpop.eup %2378 }
 0xf02   :  { %v2381_v59 = vpop.eup %2380  ;;  %1334 = vrot.lane.b32.xlu1 %v2379_v58, %s2539_s2 }
 0xf03   :  { %1317 = vrot.lane.b32.xlu0 %v2381_v59, %s2539_s2  ;;  %v2383_v63 = vpop.eup %2382 }
 0xf04   :  { %v2385_v1 = vpop.eup %2384  ;;  %v1307_v2 = vadd.f32 1.0, %v2383_v63  ;;  %v2121_v63 = vld.sshfl [vmem:[#allocation2 + $0x1c] sm:$0x33 pattern:$0x76325410] }
 0xf05   :  { %v1308_v3 = vadd.f32 1.0, %v2385_v1 }
 0xf06   :  { %2386 = vrcp.f32 %v1307_v2  ;;  %v1724_v2 = vcombine.high %v2121_v63, %v2121_v63 }
 0xf07   :  { %2388 = vrcp.f32 %v1308_v3 }
 0xf10   :  { %v2387_v4 = vpop.eup %2386 }
 0xf11   :  { %v2389_v8 = vpop.eup %2388  ;;  %v1332_v14 = vmul.f32 %v2387_v4, %v1128_v37 }
 0xf12   :  { %v1315_v16 = vmul.f32 %v2389_v8, %v1111_v40 }
 0xf74   :  { %v1335_v7 = vpop.permute.xlu1 %1334 }
 0xf75   :  { %v1337_v9 = vmul.f32 %v2387_v4, %v1335_v7  ;;  %v1318_v10 = vpop.permute.xlu0 %1317 }
 0xf76   :  { %v1320_v12 = vmul.f32 %v2389_v8, %v1318_v10 }
 0xf77   :  { %1339 = vrot.lane.b32.xlu1 %v1337_v9, %s2540_s16 }
 0xf78   :  { %1322 = vrot.lane.b32.xlu0 %v1320_v12, %s2540_s16 }
 0xfe9   :  { %v1340_v15 = vpop.permute.xlu1 %1339 }
 0xfea   :  { %v1342_v18 = vadd.f32 %v1340_v15, %v1332_v14  ;;  %v1323_v19 = vpop.permute.xlu0 %1322 }
 0xfeb   :  { %v1325_v20 = vadd.f32 %v1323_v19, %v1315_v16 }
 0xfec   :  { %2390 = vtanh.f32 %v1342_v18 }
 0xfed   :  { %2392 = vtanh.f32 %v1325_v20 }
 0xff6   :  { %v2391_v21 = vpop.eup %2390 }
 0xff7   :  { %v2393_v22 = vpop.eup %2392  ;;  %1345 = vrot.lane.b32.xlu1 %v2391_v21, %s2539_s2 }
 0xff8   :  { %1328 = vrot.lane.b32.xlu0 %v2393_v22, %s2539_s2 }
0x1069   :  { %v1346_v23 = vpop.permute.xlu1 %1345 }
0x106a   :  { %v1348_v24 = vmul.f32 %v2387_v4, %v1346_v23  ;;  %v1329_v25 = vpop.permute.xlu0 %1328 }
0x106b   :  { %v1331_v26 = vmul.f32 %v2389_v8, %v1329_v25 }
0x106c   :  { %1426 = vrot.lane.b32.xlu1 %v1348_v24, %s2540_s16 }
0x106d   :  { %1350 = vrot.lane.b32.xlu0 %v1331_v26, %s2540_s16 }
0x10de   :  { %v1427_v28 = vpop.permute.xlu1 %1426 }
0x10df   :  { %v1351_v27 = vpop.permute.xlu0 %1350 }
0x10e0   :  { %2114 = vmatmul.mubr.msk.f32.vlgmr.msra.gmra.mrb[8].mxu0 %vm273_vm1, %v1351_v27 }
0x10e1   :  { %2236 = vmatpush1.bf16.msra.mxu0 %v2681_v56  ;;  %1494 = vmatprep.mubr.f32.mxu0 %v2537_v0 }
0x10e2   :  { %2238 = vmatprep.subr.bf16.mxu0 %v2686_v57 }
0x10e5   :  { %2240 = vmatpush1.bf16.msra.mxu0 %v2691_v60 }
0x10e6   :  { %2258 = vmatprep.subr.bf16.mxu0 %v2664_v39 }
0x10e8   :  { %2115 = vmatmul.mubr.msk.f32.vlgmr.msra.gmra.mrb[8].mxu0 %vm273_vm1, %v1427_v28 }
0x10e9   :  { %2260 = vmatpush1.bf16.msra.mxu0 %v2666_v43  ;;  %1846 = vmatprep.mubr.f32.mxu0 %v2537_v0 }
0x10ea   :  { %2262 = vmatprep.subr.bf16.mxu0 %v2668_v44 }
0x10ed   :  { %2264 = vmatpush1.bf16.msra.mxu0 %v2673_v49 }
0x10ee   :  { %2266 = vmatprep.subr.bf16.mxu0 %v2677_v50 }
0x11bb   :  { %v1496_v31 = vpop.f32.mrb[8].mxu0 }
0x11bc   :  { %v1513_v32 = vadd.f32 %v2116_v29, %v1496_v31  ;;  %v1498_v33 = vpop.f32.mrb[9].mxu0 }
0x11bd   :  { %v1514_v34 = vadd.f32 %v1510_v30, %v1498_v33 }
0x11be   :  { %2394 = vtanh.f32 %v1513_v32  ;;  %v2117_v43 = vmul.f32 -1.442695, %v1513_v32 }
0x11bf   :  { %2396 = vtanh.f32 %v1514_v34  ;;  %v2118_v44 = vmul.f32 -1.442695, %v1514_v34 }
0x11c0   :  { %2398 = vpow2.f32 %v2117_v43 }
0x11c1   :  { %2400 = vpow2.f32 %v2118_v44 }
0x11c8   :  { %v2395_v39 = vpop.eup %2394 }
0x11c9   :  { %v2397_v35 = vpop.eup %2396  ;;  %1548 = vrot.lane.b32.xlu1 %v2395_v39, %s2539_s2 }
0x11ca   :  { %1531 = vrot.lane.b32.xlu0 %v2397_v35, %s2539_s2  ;;  %v2399_v49 = vpop.eup %2398 }
0x11cb   :  { %v2401_v50 = vpop.eup %2400  ;;  %v1521_v36 = vadd.f32 1.0, %v2399_v49 }
0x11cc   :  { %v1522_v37 = vadd.f32 1.0, %v2401_v50 }
0x11cd   :  { %2402 = vrcp.f32 %v1521_v36 }
0x11ce   :  { %2404 = vrcp.f32 %v1522_v37 }
0x11d7   :  { %v2403_v38 = vpop.eup %2402 }
0x11d8   :  { %v2405_v41 = vpop.eup %2404  ;;  %v1546_v47 = vmul.f32 %v2403_v38, %v1342_v18 }
0x11d9   :  { %v1529_v51 = vmul.f32 %v2405_v41, %v1325_v20 }
0x123b   :  { %v1549_v40 = vpop.permute.xlu1 %1548 }
0x123c   :  { %v1551_v42 = vmul.f32 %v2403_v38, %v1549_v40  ;;  %v1532_v45 = vpop.permute.xlu0 %1531 }
0x123d   :  { %v1534_v46 = vmul.f32 %v2405_v41, %v1532_v45 }
0x123e   :  { %1553 = vrot.lane.b32.xlu1 %v1551_v42, %s2540_s16 }
0x123f   :  { %1536 = vrot.lane.b32.xlu0 %v1534_v46, %s2540_s16 }
0x12b0   :  { %v1554_v48 = vpop.permute.xlu1 %1553 }
0x12b1   :  { %v1556_v52 = vadd.f32 %v1554_v48, %v1546_v47  ;;  %v1537_v53 = vpop.permute.xlu0 %1536 }
0x12b2   :  { %v1539_v54 = vadd.f32 %v1537_v53, %v1529_v51  ;;  %v1953_v53 = vld [vmem:[%s2894_s5 + $0x8] sm:$0xff] }
0x12b3   :  { %2406 = vtanh.f32 %v1556_v52 }
0x12b4   :  { %2408 = vtanh.f32 %v1539_v54 }
0x12bd   :  { %v2407_v55 = vpop.eup %2406 }
0x12be   :  { %v2409_v11 = vpop.eup %2408  ;;  %1559 = vrot.lane.b32.xlu1 %v2407_v55, %s2539_s2  ;;  %v2541_v55 = vmov 0.0|0.0  }
0x12bf   :  { %1542 = vrot.lane.b32.xlu0 %v2409_v11, %s2539_s2 }
0x1330   :  { %v1560_v13 = vpop.permute.xlu1 %1559 }
0x1331   :  { %v1562_v17 = vmul.f32 %v2403_v38, %v1560_v13  ;;  %v1543_v58 = vpop.permute.xlu0 %1542  ;;  %v1955_v13 = vld [vmem:[%s2894_s5 + $0x18] sm:$0xff] }
0x1332   :  { %v1545_v59 = vmul.f32 %v2405_v41, %v1543_v58 }
0x1333   :  { %1640 = vrot.lane.b32.xlu1 %v1562_v17, %s2540_s16 }
0x1334   :  { %1564 = vrot.lane.b32.xlu0 %v1545_v59, %s2540_s16 }
0x13a5   :  { %v1641_v62 = vpop.permute.xlu1 %1640 }
0x13a6   :  { %v1565_v61 = vpop.permute.xlu0 %1564 }
0x13a7   :  { %2119 = vmatmul.mubr.msk.f32.vlgmr.msra.gmra.mrb[6].mxu1 %vm273_vm1, %v1565_v61 }
0x13a8   :  { %2252 = vmatpush1.bf16.msra.mxu1 %v2681_v56  ;;  %1708 = vmatprep.mubr.f32.mxu1 %v2537_v0 }
0x13a9   :  { %2254 = vmatprep.subr.bf16.mxu1 %v2686_v57 }
0x13ac   :  { %2256 = vmatpush1.bf16.msra.mxu1 %v2691_v60 }
0x13ad   :  { %2273 = vmatprep.subr.bf16.mxu1 %v2541_v55 }
0x13af   :  { %2120 = vmatmul.mubr.msk.f32.vlgmr.msra.gmra.mrb[6].mxu1 %vm273_vm1, %v1641_v62 }
0x13b0   :  { %2142 = vmatprep.mubr.msk.f32.mxu1 %vm2542_vm2, %v2537_v0 }
0x1482   :  { %v1710_v1 = vpop.f32.mrb[6].mxu1 }
0x1483   :  { %v1727_v3 = vadd.f32 %v2121_v63, %v1710_v1  ;;  %v1712_v4 = vpop.f32.mrb[7].mxu1  ;;  %v2127_v63 = vld [vmem:[%s2895_s6] ss:$0 sm:$0xff]  ;;  %s2544_s6 = smov [#allocation9]  }
0x1484   :  { %v1728_v7 = vadd.f32 %v1724_v2, %v1712_v4  ;;  %s2073_s12 = sshll.u32 %s2544_s6, 4  ;;  %s2074_s12 = int_to_ptr.vmem [resolvable:$true] %s2073_s12 }
0x1485   :  { %2410 = vtanh.f32 %v1727_v3  ;;  %v2122_v10 = vmul.f32 -1.442695, %v1727_v3  ;;  %p2509_p11 = scmp.lt.s32.totalorder %s2074_s12, %s2074_s12 }
0x1486   :  { %2412 = vtanh.f32 %v1728_v7  ;;  %v2123_v12 = vmul.f32 -1.442695, %v1728_v7 }
0x1487   :  { %2414 = vpow2.f32 %v2122_v10  ;;  %v2038_v10 = vld [vmem:[%s2896_s7] sm:$0x1]  ;;  %s2504_s7 = scalar_lea.vmem %s2074_s12, 32 }
0x1488   :  { %2416 = vpow2.f32 %v2123_v12  ;;  %vm2039_vm3 = vcmp.ne.f32.partialorder %v2038_v10, 0.0  ;;  %p2505_p10 = scmp.ne.s32.totalorder %s2074_s12, %s2504_s7  ;;  %p2510_p12 = scmp.lt.s32.totalorder %s2504_s7, %s2504_s7 }
0x148a   :  { %p2511_p13 = por %p2510_p12, %p2509_p11 }
0x148c   :  { %p2512_p0 = pnand %p2511_p13, %p2505_p10 }
0x148f   :  { %v2411_v8 = vpop.eup %2410 }
0x1490   :  { %v2413_v9 = vpop.eup %2412  ;;  %1762 = vrot.lane.b32.xlu1 %v2411_v8, %s2539_s2 }
0x1491   :  { %1745 = vrot.lane.b32.xlu0 %v2413_v9, %s2539_s2  ;;  %v2415_v14 = vpop.eup %2414 }
0x1492   :  { %v2417_v15 = vpop.eup %2416  ;;  %v1735_v16 = vadd.f32 1.0, %v2415_v14 }
0x1493   :  { %v1736_v18 = vadd.f32 1.0, %v2417_v15 }
0x1494   :  { %2418 = vrcp.f32 %v1735_v16  ;;  %v2543_v16 = vmov 0  }
0x1495   :  { %2420 = vrcp.f32 %v1736_v18  ;;  %v2040_v18 = vsel %vm2039_vm3, 1, %v2543_v16 }
0x149e   :  { %v2419_v19 = vpop.eup %2418 }
0x149f   :  { %v2421_v21 = vpop.eup %2420  ;;  %v1760_v25 = vmul.f32 %v2419_v19, %v1556_v52  ;;  %v1952_v52 = vld [vmem:[%s2894_s5] sm:$0xff] }
0x14a0   :  { %v1743_v27 = vmul.f32 %v2421_v21, %v1539_v54  ;;  %v1954_v54 = vld [vmem:[%s2894_s5 + $0x10] sm:$0xff]  ;;  %v2274_v11 = vpack.c.bf16 %v1953_v53, %v1952_v52 }
0x14a1   :  { %v2277_v17 = vpack.c.bf16 %v1955_v13, %v1954_v54 }
0x14a2   :  { %2275 = vmatpush3.bf16.msra.mxu1 %v2274_v11 }
0x14a3   :  { %2276 = vmatprep.subr.bf16.mxu1 %v2541_v55 }
0x14a6   :  { %2278 = vmatpush3.bf16.msra.mxu1 %v2277_v17 }
0x1502   :  { %v1763_v20 = vpop.permute.xlu1 %1762 }
0x1503   :  { %v1765_v22 = vmul.f32 %v2419_v19, %v1763_v20  ;;  %v1746_v23 = vpop.permute.xlu0 %1745 }
0x1504   :  { %v1748_v24 = vmul.f32 %v2421_v21, %v1746_v23  ;;  %v2044_v23 = vrot.slane %v2040_v18, %v93_v6 }
0x1505   :  { %1767 = vrot.lane.b32.xlu1 %v1765_v22, %s2540_s16 }
0x1506   :  { %1750 = vrot.lane.b32.xlu0 %v1748_v24, %s2540_s16  ;;  %vm2045_vm6 = vcmp.eq.s32.totalorder %v2044_v23, 1 }
0x1577   :  { %v1768_v26 = vpop.permute.xlu1 %1767 }
0x1578   :  { %v1770_v28 = vadd.f32 %v1768_v26, %v1760_v25  ;;  %v1751_v29 = vpop.permute.xlu0 %1750 }
0x1579   :  { %v1753_v31 = vadd.f32 %v1751_v29, %v1743_v27 }
0x157a   :  { %2422 = vtanh.f32 %v1770_v28 }
0x157b   :  { %2424 = vtanh.f32 %v1753_v31 }
0x1584   :  { %v2423_v30 = vpop.eup %2422 }
0x1585   :  { %v2425_v32 = vpop.eup %2424  ;;  %1773 = vrot.lane.b32.xlu1 %v2423_v30, %s2539_s2 }
0x1586   :  { %1756 = vrot.lane.b32.xlu0 %v2425_v32, %s2539_s2 }
0x15f7   :  { %v1774_v33 = vpop.permute.xlu1 %1773 }
0x15f8   :  { %v1776_v34 = vmul.f32 %v2419_v19, %v1774_v33  ;;  %v1757_v39 = vpop.permute.xlu0 %1756 }
0x15f9   :  { %v1759_v35 = vmul.f32 %v2421_v21, %v1757_v39 }
0x15fa   :  { %1853 = vrot.lane.b32.xlu1 %v1776_v34, %s2540_s16 }
0x15fb   :  { %1778 = vrot.lane.b32.xlu0 %v1759_v35, %s2540_s16 }
0x166c   :  { %v1854_v44 = vpop.permute.xlu1 %1853 }
0x166d   :  { %v1779_v43 = vpop.permute.xlu0 %1778 }
0x166e   :  { %2124 = vmatmul.mubr.msk.f32.vlgmr.msra.gmra.mrb[10].mxu0 %vm273_vm1, %v1779_v43 }
0x166f   :  { %2268 = vmatpush1.bf16.msra.mxu0 %v2681_v56  ;;  %1921 = vmatprep.mubr.f32.mxu0 %v2537_v0 }
0x1670   :  { %2270 = vmatprep.subr.bf16.mxu0 %v2686_v57 }
0x1673   :  { %2272 = vmatpush1.bf16.msra.mxu0 %v2691_v60 }
0x1676   :  { %2125 = vmatmul.mubr.msk.f32.vlgmr.msra.gmra.mrb[12].mxu0 %vm273_vm1, %v1854_v44 }
0x1741   :  { %v1848_v49 = vpop.f32.mrb[10].mxu0 }
0x1742   :  { %v1849_v50 = vpop.f32.mrb[11].mxu0 }
0x1749   :  { %v1923_v36 = vpop.f32.mrb[12].mxu0 }
0x174a   :  { %v1924_v37 = vpop.f32.mrb[13].mxu0 }
0x174b   :  { %v1925_v38 = vadd.f32 %v1924_v37, %v1849_v50 }
0x174d   :  { %v1927_v40 = vadd.f32 %v1925_v38, %v1724_v2 }
0x174f   :  { %2426 = vtanh.f32 %v1927_v40  ;;  %v2126_v56 = vmul.f32 -1.442695, %v1927_v40 }
0x1751   :  { %2428 = vpow2.f32 %v2126_v56 }
0x1759   :  { %v2427_v41 = vpop.eup %2426 }
0x175a   :  { %1937 = vrot.lane.b32.xlu0 %v2427_v41, %s2539_s2 }
0x175b   :  { %v2429_v42 = vpop.eup %2428 }
0x175c   :  { %v1931_v45 = vadd.f32 1.0, %v2429_v42 }
0x175e   :  { %2430 = vrcp.f32 %v1931_v45 }
0x1768   :  { %v2431_v57 = vpop.eup %2430 }
0x1769   :  { %v1935_v47 = vmul.f32 %v2431_v57, %v1753_v31 }
0x17cc   :  { %v1938_v60 = vpop.permute.xlu0 %1937 }
0x17cd   :  { %v1940_v46 = vmul.f32 %v2431_v57, %v1938_v60 }
0x17cf   :  { %1942 = vrot.lane.b32.xlu1 %v1940_v46, %s2540_s16 }
0x1841   :  { %v1943_v48 = vpop.permute.xlu1 %1942 }
0x1842   :  { %v1945_v51 = vadd.f32 %v1943_v48, %v1935_v47 }
0x1844   :  { %2432 = vtanh.f32 %v1945_v51 }
0x184e   :  { %v2433_v58 = vpop.eup %2432 }
0x184f   :  { %1948 = vrot.lane.b32.xlu0 %v2433_v58, %s2539_s2 }
0x18c1   :  { %v1949_v59 = vpop.permute.xlu0 %1948 }
0x18c2   :  { %v1951_v61 = vmul.f32 %v2431_v57, %v1949_v59 }
0x18c4   :  { %1964 = vrot.lane.b32.xlu1 %v1951_v61, %s2540_s16 }
0x1936   :  { %v1965_v62 = vpop.permute.xlu1 %1964 }
0x1937   :  { %2143 = vmatmul.mubr.msk.f32.vlgmr.msra.gmra.mrb[8].mxu1 %vm273_vm1, %v1965_v62 }
0x1a0a   :  { %v2034_v1 = vpop.f32.mrb[8].mxu1 }
0x1a0b   :  { %v2035_v0 = vadd.f32 %v2127_v63, %v2034_v1  ;;  %v2144_v2 = vpop.f32.mrb[9].mxu1 }
0x1a0d   :  { %v2049_v3 = vand.u32 2147483647, %v2035_v0  ;;  %v2046_v22 = vmax.f32 %v2035_v0, 0.0  ;;  %vm2047_vm5 = vcmp.ne.f32.partialorder %v2035_v0, %v2035_v0 }
0x1a0f   :  { %v2050_v4 = vsub.f32 0.0, %v2049_v3 }
0x1a11   :  { %v2051_v7 = vmul.f32 1.442695, %v2050_v4 }
0x1a13   :  { %2434 = vpow2.f32 %v2051_v7 }
0x1a1d   :  { %v2435_v8 = vpop.eup %2434 }
0x1a1e   :  { %v2053_v9 = vadd.f32 1.0, %v2435_v8  ;;  %v2056_v12 = vmul.f32 -0.5, %v2435_v8  ;;  %v2059_v15 = vand.u32 2147483647, %v2435_v8 }
0x1a20   :  { %2436 = vlog2.f32 %v2053_v9  ;;  %v2057_v14 = vadd.f32 1.0, %v2056_v12  ;;  %vm2060_vm4 = vcmp.lt.f32.partialorder %v2059_v15, 0.0004427343 }
0x1a22   :  { %v2058_v21 = vmul.f32 %v2435_v8, %v2057_v14 }
0x1a2a   :  { %v2437_v19 = vpop.eup %2436 }
0x1a2b   :  { %v2055_v20 = vmul.f32 0.6931472, %v2437_v19 }
0x1a2d   :  { %v2061_v24 = vsel %vm2060_vm4, %v2058_v21, %v2055_v20 }
0x1a2e   :  { %v2062_v25 = vadd.f32 %v2061_v24, %v2046_v22 }
0x1a30   :  { %v2063_v26 = vsel %vm2047_vm5, %v2035_v0, %v2062_v25 }
0x1a31   :  { %v2064_v27 = vadd.f32 0.001, %v2063_v26 }
0x1a33   :  { %v2065_v28 = vsel %vm2045_vm6, %v2064_v27, %v2035_v0 }
0x1a34   :  { %2066 = vst [vmem:[#allocation9] sm:$0x3] %v2065_v28 }
0x1a35   :  { %2515 = shalt.err (!%p2512_p0)
}
0x1a36   :  { %s2516_s17 = scalar_lea.hbm %s2897_s8, 32 }
0x1a37   :  { %p2517_p1 = scmp.ne.s32.totalorder %s2897_s8, %s2516_s17  ;;  %p2520_p2 = scmp.lt.u32.totalorder %s2516_s17, %s2897_s8 }
0x1a39   :  { %p2522_p3 = pnand %p2520_p2, %p2517_p1 }
0x1a3b   :  { %2525 = shalt.err (!%p2522_p3)
}
0x1a3c   :  { %2076 = dma.vmem_to_hbm [thread:$0]  %s2074_s12, 32, %s2897_s8, [#allocation5]  }
0x1a3d   :  { %2530 = dma.done.wait [#allocation5], 32  }
0x1a3e   :  { %2531 = vsyncadd [#allocation5], 4294967264 }
0x1a3f   :  { %2080 = vsyncpa [#allocation4], 1 }
0x1a40   :  { %2081 = vsyncpa [#allocation7], 1 }
0x1a41   :  { %2082 = vsyncpa [#allocation5], 1 }

</bundles_post_ra>
